<compile_context>
chip_gen: v7x
topology: tpu7x:2x2x1
jax: 0.10.0
libtpu: 0.0.40
codegen_flags: <defaults>
</compile_context>

<pallas_src>
import jax
import jax.numpy as jnp
import numpy as np
from jax import lax
from jax.experimental import pallas as pl
from jax.experimental.pallas import tpu as pltpu


def _round_up(x, m):
    return ((x + m - 1) // m) * m


def _decoder_att_kernel(scal_ref,      # SMEM (2,)   : [conv1_b, conv3_b+conv5_b+conv7_b]
                        w1_ref,        # SMEM (C,)   : 1x1 conv weights
                        weff_ref,      # SMEM (7, 7) : folded 3x3+5x5+7x7 kernel
                        chatt_ref,     # SMEM (B, C) : sigmoid(channel attention)
                        x_ref,         # VMEM (1, C, H, W)
                        out_ref,       # VMEM (1, C, H, W)
                        pad_ref):      # VMEM (HP, WP) zero-padded spatial plane
    _, C, H, W = x_ref.shape
    HP, WP = pad_ref.shape
    b = pl.program_id(0)

    # ---------------- spatial attention: 1x1 conv (C -> 1) ----------------
    sp = jnp.full((H, W), scal_ref[0], dtype=jnp.float32)
    for c in range(C):                           # C broadcast-FMAs on the VPU
        sp = sp + w1_ref[c] * x_ref[0, c]

    # Lane-dense zero-padded plane.  sp lives at rows [3, 3+H), cols [0, W);
    # everything else stays zero.  Re-zeroed every step (cheap vs. the x/out
    # traffic, and correct under "parallel" core sharding of the batch axis).
    pad_ref[...] = jnp.zeros_like(pad_ref)
    pad_ref[3:3 + H, 0:W] = sp

    # ------- fused 3x3 + 5x5 + 7x7 "same" conv == one 7x7, 49 taps ---------
    # Tap (dy, dx) needs padded[i+dy, j+dx-3]:
    #   dy -> sublane-offset row load from the scratch,
    #   dx -> static lane rotation; circular wrap lands in zero columns
    #         (WP >= W + 3), so the roll reproduces exact zero padding.
    acc = jnp.full((H, WP), scal_ref[1], dtype=jnp.float32)      # b3+b5+b7
    for dy in range(7):
        rows = pad_ref[dy:dy + H, :]             # (H, WP)
        for dx in range(7):
            if dx == 3:
                shifted = rows
            else:
                shifted = pltpu.roll(rows, shift=(3 - dx) % WP, axis=1)
            acc = acc + weff_ref[dy, dx] * shifted
    sp_att = jax.nn.sigmoid(acc[:, 0:W])         # (H, W)

    # ------------ fused output: sigmoid(sp) * x * sigmoid(ch) --------------
    for c in range(C):
        out_ref[0, c] = (x_ref[0, c] * sp_att * chatt_ref[b, c]).astype(out_ref.dtype)


def decoder_att_forward(x, p):
    """x: (B, C, H, W) float32 (NCHW, same as PyTorch).  Returns (B, C, H, W)."""
    B, C, H, W = x.shape
    x = x.astype(jnp.float32)

    # Fold the three "same" single-channel convs into one effective 7x7 kernel.
    w_eff = p["conv7_w"].astype(jnp.float32)
    w_eff = w_eff.at[1:6, 1:6].add(p["conv5_w"])
    w_eff = w_eff.at[2:5, 2:5].add(p["conv3_w"])
    scal_b = jnp.stack(
        [p["conv1_b"], p["conv3_b"] + p["conv5_b"] + p["conv7_b"]]
    ).astype(jnp.float32)
    w1 = p["conv1_w"].astype(jnp.float32)                        # (C,)

    # Channel attention hoisted out of the kernel: one batched (B,C)@(C,C)
    # matmul pair instead of a per-grid-step (1,C) MXU push/pop + spatial max.
    # NOTE: torch's .squeeze() would also drop the batch dim when B == 1;
    # we keep the B > 1 semantics here.
    mp = jnp.max(x, axis=(2, 3))                                 # (B, C)
    h = jax.nn.relu(mp @ p["fc1_w"].T + p["fc1_b"])
    ch_att = jax.nn.sigmoid(h @ p["fc2_w"].T + p["fc2_b"])       # (B, C)

    HP = _round_up(H + 6, 8)      # 3 zero rows above and below sp
    WP = _round_up(W + 3, 128)    # >= 3 zero cols so circular rolls wrap into zeros

    grid_spec = pltpu.PrefetchScalarGridSpec(
        num_scalar_prefetch=4,                 # biases, w1, w_eff, ch_att -> SMEM
        grid=(B,),
        in_specs=[pl.BlockSpec((1, C, H, W), lambda b, *_: (b, 0, 0, 0))],
        out_specs=pl.BlockSpec((1, C, H, W), lambda b, *_: (b, 0, 0, 0)),
        scratch_shapes=[pltpu.VMEM((HP, WP), jnp.float32)],
    )

    # TODO(synk): for large decoder maps (e.g. 256x256x64) add a row-tiled grid
    # axis (3-row halo) so blocks fit v7x's 64 MiB VMEM, and optionally narrow
    # the HBM-facing x/out dtype to bf16; whole-image f32 blocks are fine here.
    return pl.pallas_call(
        _decoder_att_kernel,
        out_shape=jax.ShapeDtypeStruct((B, C, H, W), jnp.float32),
        grid_spec=grid_spec,
        compiler_params=pltpu.CompilerParams(
            dimension_semantics=("parallel",),   # batch elems independent (v7x 2 TCs)
            vmem_limit_bytes=64 * 1024 * 1024,
        ),
    )(scal_b, w1, w_eff, ch_att, x)


# ---------------- pure-JAX reference (mirrors the PyTorch forward) -------------
def reference_forward(x, p):
    sp = jnp.einsum("bchw,c->bhw", x, p["conv1_w"])[:, None, :, :] + p["conv1_b"]

    def conv(s, w, pad):
        return lax.conv_general_dilated(
            s, w[None, None, :, :], window_strides=(1, 1),
            padding=[(pad, pad), (pad, pad)],
            dimension_numbers=("NCHW", "OIHW", "NCHW"))

    sp_att = (conv(sp, p["conv3_w"], 1) + p["conv3_b"]
              + conv(sp, p["conv5_w"], 2) + p["conv5_b"]
              + conv(sp, p["conv7_w"], 3) + p["conv7_b"])
    sp_att = jax.nn.sigmoid(sp_att)

    # NOTE: torch .squeeze() would also drop batch when B == 1; we assume B > 1.
    ch = jnp.max(x, axis=(2, 3))                                 # (B, C)
    h = jax.nn.relu(ch @ p["fc1_w"].T + p["fc1_b"])
    ch_att = jax.nn.sigmoid(h @ p["fc2_w"].T + p["fc2_b"])[:, :, None, None]
    return sp_att * x * ch_att


def init_params(key, C):
    ks = jax.random.split(key, 12)
    n = lambda k, shape, s: (s * jax.random.normal(k, shape)).astype(jnp.float32)
    return {
        "conv1_w": n(ks[0], (C,), 0.3), "conv1_b": n(ks[1], (), 0.1),
        "conv3_w": n(ks[2], (3, 3), 0.3), "conv3_b": n(ks[3], (), 0.1),
        "conv5_w": n(ks[4], (5, 5), 0.2), "conv5_b": n(ks[5], (), 0.1),
        "conv7_w": n(ks[6], (7, 7), 0.15), "conv7_b": n(ks[7], (), 0.1),
        "fc1_w": n(ks[8], (C, C), 0.3), "fc1_b": n(ks[9], (C,), 0.1),
        "fc2_w": n(ks[10], (C, C), 0.3), "fc2_b": n(ks[11], (C,), 0.1),
    }


if __name__ == "__main__":
    key = jax.random.PRNGKey(0)
    B, C, H, W = 2, 8, 16, 16
    kx, kp = jax.random.split(key)
    x = jax.random.normal(kx, (B, C, H, W), dtype=jnp.float32)
    params = init_params(kp, C)

    out = jax.block_until_ready(jax.jit(decoder_att_forward)(x, params))
    ref = jax.block_until_ready(reference_forward(x, params))

    assert out.shape == (B, C, H, W)
    np.testing.assert_allclose(np.asarray(out), np.asarray(ref), atol=1e-4, rtol=1e-4)
    print("KERNEL_OK")
</pallas_src>

<mosaic_0001>
module attributes {stable_mosaic.version = 11 : i64} {
  func.func @_decoder_att_kernel(%arg0: i32, %arg1: memref<2xf32, #tpu.memory_space<smem>>, %arg2: memref<8xf32, #tpu.memory_space<smem>>, %arg3: memref<7x7xf32, #tpu.memory_space<smem>>, %arg4: memref<2x8xf32, #tpu.memory_space<smem>>, %arg5: memref<1x8x16x16xf32, #tpu.memory_space<vmem>>, %arg6: memref<1x8x16x16xf32, #tpu.memory_space<vmem>>, %arg7: memref<24x128xf32, #tpu.memory_space<vmem>>) attributes {dimension_semantics = [#tpu.dimension_semantics<parallel>], iteration_bounds = array<i64: 2>, scalar_prefetch = 4 : i64, scratch_operands = 1 : i64, tpu.core_type = #tpu.core_type<tc>, window_params = [{transform_indices = @transform_0, window_bounds = array<i64: 1, 8, 16, 16>}, {transform_indices = @transform_1, window_bounds = array<i64: 1, 8, 16, 16>}]} {
    %c0 = arith.constant 0 : index
    %0 = memref.load %arg1[%c0] : memref<2xf32, #tpu.memory_space<smem>>
    %1 = vector.broadcast %0 : f32 to vector<16x16xf32>
    %c0_0 = arith.constant 0 : index
    %2 = memref.load %arg2[%c0_0] : memref<8xf32, #tpu.memory_space<smem>>
    %c0_1 = arith.constant 0 : index
    %c0_2 = arith.constant 0 : index
    %c0_3 = arith.constant 0 : index
    %c0_4 = arith.constant 0 : index
    %3 = vector.load %arg5[%c0_1, %c0_2, %c0_3, %c0_4] : memref<1x8x16x16xf32, #tpu.memory_space<vmem>>, vector<1x1x16x16xf32>
    %4 = vector.shape_cast %3 : vector<1x1x16x16xf32> to vector<16x16xf32>
    %5 = vector.broadcast %2 : f32 to vector<16x16xf32>
    %6 = arith.mulf %5, %4 : vector<16x16xf32>
    %7 = arith.addf %1, %6 : vector<16x16xf32>
    %c1 = arith.constant 1 : index
    %8 = memref.load %arg2[%c1] : memref<8xf32, #tpu.memory_space<smem>>
    %c0_5 = arith.constant 0 : index
    %c1_6 = arith.constant 1 : index
    %c0_7 = arith.constant 0 : index
    %c0_8 = arith.constant 0 : index
    %9 = vector.load %arg5[%c0_5, %c1_6, %c0_7, %c0_8] : memref<1x8x16x16xf32, #tpu.memory_space<vmem>>, vector<1x1x16x16xf32>
    %10 = vector.shape_cast %9 : vector<1x1x16x16xf32> to vector<16x16xf32>
    %11 = vector.broadcast %8 : f32 to vector<16x16xf32>
    %12 = arith.mulf %11, %10 : vector<16x16xf32>
    %13 = arith.addf %7, %12 : vector<16x16xf32>
    %c2 = arith.constant 2 : index
    %14 = memref.load %arg2[%c2] : memref<8xf32, #tpu.memory_space<smem>>
    %c0_9 = arith.constant 0 : index
    %c2_10 = arith.constant 2 : index
    %c0_11 = arith.constant 0 : index
    %c0_12 = arith.constant 0 : index
    %15 = vector.load %arg5[%c0_9, %c2_10, %c0_11, %c0_12] : memref<1x8x16x16xf32, #tpu.memory_space<vmem>>, vector<1x1x16x16xf32>
    %16 = vector.shape_cast %15 : vector<1x1x16x16xf32> to vector<16x16xf32>
    %17 = vector.broadcast %14 : f32 to vector<16x16xf32>
    %18 = arith.mulf %17, %16 : vector<16x16xf32>
    %19 = arith.addf %13, %18 : vector<16x16xf32>
    %c3 = arith.constant 3 : index
    %20 = memref.load %arg2[%c3] : memref<8xf32, #tpu.memory_space<smem>>
    %c0_13 = arith.constant 0 : index
    %c3_14 = arith.constant 3 : index
    %c0_15 = arith.constant 0 : index
    %c0_16 = arith.constant 0 : index
    %21 = vector.load %arg5[%c0_13, %c3_14, %c0_15, %c0_16] : memref<1x8x16x16xf32, #tpu.memory_space<vmem>>, vector<1x1x16x16xf32>
    %22 = vector.shape_cast %21 : vector<1x1x16x16xf32> to vector<16x16xf32>
    %23 = vector.broadcast %20 : f32 to vector<16x16xf32>
    %24 = arith.mulf %23, %22 : vector<16x16xf32>
    %25 = arith.addf %19, %24 : vector<16x16xf32>
    %c4 = arith.constant 4 : index
    %26 = memref.load %arg2[%c4] : memref<8xf32, #tpu.memory_space<smem>>
    %c0_17 = arith.constant 0 : index
    %c4_18 = arith.constant 4 : index
    %c0_19 = arith.constant 0 : index
    %c0_20 = arith.constant 0 : index
    %27 = vector.load %arg5[%c0_17, %c4_18, %c0_19, %c0_20] : memref<1x8x16x16xf32, #tpu.memory_space<vmem>>, vector<1x1x16x16xf32>
    %28 = vector.shape_cast %27 : vector<1x1x16x16xf32> to vector<16x16xf32>
    %29 = vector.broadcast %26 : f32 to vector<16x16xf32>
    %30 = arith.mulf %29, %28 : vector<16x16xf32>
    %31 = arith.addf %25, %30 : vector<16x16xf32>
    %c5 = arith.constant 5 : index
    %32 = memref.load %arg2[%c5] : memref<8xf32, #tpu.memory_space<smem>>
    %c0_21 = arith.constant 0 : index
    %c5_22 = arith.constant 5 : index
    %c0_23 = arith.constant 0 : index
    %c0_24 = arith.constant 0 : index
    %33 = vector.load %arg5[%c0_21, %c5_22, %c0_23, %c0_24] : memref<1x8x16x16xf32, #tpu.memory_space<vmem>>, vector<1x1x16x16xf32>
    %34 = vector.shape_cast %33 : vector<1x1x16x16xf32> to vector<16x16xf32>
    %35 = vector.broadcast %32 : f32 to vector<16x16xf32>
    %36 = arith.mulf %35, %34 : vector<16x16xf32>
    %37 = arith.addf %31, %36 : vector<16x16xf32>
    %c6 = arith.constant 6 : index
    %38 = memref.load %arg2[%c6] : memref<8xf32, #tpu.memory_space<smem>>
    %c0_25 = arith.constant 0 : index
    %c6_26 = arith.constant 6 : index
    %c0_27 = arith.constant 0 : index
    %c0_28 = arith.constant 0 : index
    %39 = vector.load %arg5[%c0_25, %c6_26, %c0_27, %c0_28] : memref<1x8x16x16xf32, #tpu.memory_space<vmem>>, vector<1x1x16x16xf32>
    %40 = vector.shape_cast %39 : vector<1x1x16x16xf32> to vector<16x16xf32>
    %41 = vector.broadcast %38 : f32 to vector<16x16xf32>
    %42 = arith.mulf %41, %40 : vector<16x16xf32>
    %43 = arith.addf %37, %42 : vector<16x16xf32>
    %c7 = arith.constant 7 : index
    %44 = memref.load %arg2[%c7] : memref<8xf32, #tpu.memory_space<smem>>
    %c0_29 = arith.constant 0 : index
    %c7_30 = arith.constant 7 : index
    %c0_31 = arith.constant 0 : index
    %c0_32 = arith.constant 0 : index
    %45 = vector.load %arg5[%c0_29, %c7_30, %c0_31, %c0_32] : memref<1x8x16x16xf32, #tpu.memory_space<vmem>>, vector<1x1x16x16xf32>
    %46 = vector.shape_cast %45 : vector<1x1x16x16xf32> to vector<16x16xf32>
    %47 = vector.broadcast %44 : f32 to vector<16x16xf32>
    %48 = arith.mulf %47, %46 : vector<16x16xf32>
    %49 = arith.addf %43, %48 : vector<16x16xf32>
    %cst = arith.constant 0.000000e+00 : f32
    %50 = vector.broadcast %cst : f32 to vector<24x128xf32>
    %c0_33 = arith.constant 0 : index
    %c0_34 = arith.constant 0 : index
    %51 = vector.load %arg7[%c0_33, %c0_34] : memref<24x128xf32, #tpu.memory_space<vmem>>, vector<24x128xf32>
    tpu.vector_store %arg7[%c0_33, %c0_34], %50 {strides = array<i32>} : memref<24x128xf32, #tpu.memory_space<vmem>>, vector<24x128xf32>,
    %c3_35 = arith.constant 3 : index
    %c0_36 = arith.constant 0 : index
    %52 = vector.load %arg7[%c3_35, %c0_36] : memref<24x128xf32, #tpu.memory_space<vmem>>, vector<16x16xf32>
    tpu.vector_store %arg7[%c3_35, %c0_36], %49 {strides = array<i32>} : memref<24x128xf32, #tpu.memory_space<vmem>>, vector<16x16xf32>,
    %c1_37 = arith.constant 1 : index
    %53 = memref.load %arg1[%c1_37] : memref<2xf32, #tpu.memory_space<smem>>
    %54 = vector.broadcast %53 : f32 to vector<16x128xf32>
    %c0_38 = arith.constant 0 : index
    %c0_39 = arith.constant 0 : index
    %55 = vector.load %arg7[%c0_38, %c0_39] : memref<24x128xf32, #tpu.memory_space<vmem>>, vector<16x128xf32>
    %c3_i32 = arith.constant 3 : i32
    %56 = tpu.dynamic_rotate %55 by %c3_i32 dim 1 : vector<16x128xf32>, i32 -> vector<16x128xf32>
    %c0_40 = arith.constant 0 : index
    %c0_41 = arith.constant 0 : index
    %57 = memref.load %arg3[%c0_40, %c0_41] : memref<7x7xf32, #tpu.memory_space<smem>>
    %58 = vector.broadcast %57 : f32 to vector<16x128xf32>
    %59 = arith.mulf %58, %56 : vector<16x128xf32>
    %60 = arith.addf %54, %59 : vector<16x128xf32>
    %c2_i32 = arith.constant 2 : i32
    %61 = tpu.dynamic_rotate %55 by %c2_i32 dim 1 : vector<16x128xf32>, i32 -> vector<16x128xf32>
    %c0_42 = arith.constant 0 : index
    %c1_43 = arith.constant 1 : index
    %62 = memref.load %arg3[%c0_42, %c1_43] : memref<7x7xf32, #tpu.memory_space<smem>>
    %63 = vector.broadcast %62 : f32 to vector<16x128xf32>
    %64 = arith.mulf %63, %61 : vector<16x128xf32>
    %65 = arith.addf %60, %64 : vector<16x128xf32>
    %c1_i32 = arith.constant 1 : i32
    %66 = tpu.dynamic_rotate %55 by %c1_i32 dim 1 : vector<16x128xf32>, i32 -> vector<16x128xf32>
    %c0_44 = arith.constant 0 : index
    %c2_45 = arith.constant 2 : index
    %67 = memref.load %arg3[%c0_44, %c2_45] : memref<7x7xf32, #tpu.memory_space<smem>>
    %68 = vector.broadcast %67 : f32 to vector<16x128xf32>
    %69 = arith.mulf %68, %66 : vector<16x128xf32>
    %70 = arith.addf %65, %69 : vector<16x128xf32>
    %c0_46 = arith.constant 0 : index
    %c3_47 = arith.constant 3 : index
    %71 = memref.load %arg3[%c0_46, %c3_47] : memref<7x7xf32, #tpu.memory_space<smem>>
    %72 = vector.broadcast %71 : f32 to vector<16x128xf32>
    %73 = arith.mulf %72, %55 : vector<16x128xf32>
    %74 = arith.addf %70, %73 : vector<16x128xf32>
    %c127_i32 = arith.constant 127 : i32
    %75 = tpu.dynamic_rotate %55 by %c127_i32 dim 1 : vector<16x128xf32>, i32 -> vector<16x128xf32>
    %c0_48 = arith.constant 0 : index
    %c4_49 = arith.constant 4 : index
    %76 = memref.load %arg3[%c0_48, %c4_49] : memref<7x7xf32, #tpu.memory_space<smem>>
    %77 = vector.broadcast %76 : f32 to vector<16x128xf32>
    %78 = arith.mulf %77, %75 : vector<16x128xf32>
    %79 = arith.addf %74, %78 : vector<16x128xf32>
    %c126_i32 = arith.constant 126 : i32
    %80 = tpu.dynamic_rotate %55 by %c126_i32 dim 1 : vector<16x128xf32>, i32 -> vector<16x128xf32>
    %c0_50 = arith.constant 0 : index
    %c5_51 = arith.constant 5 : index
    %81 = memref.load %arg3[%c0_50, %c5_51] : memref<7x7xf32, #tpu.memory_space<smem>>
    %82 = vector.broadcast %81 : f32 to vector<16x128xf32>
    %83 = arith.mulf %82, %80 : vector<16x128xf32>
    %84 = arith.addf %79, %83 : vector<16x128xf32>
    %c125_i32 = arith.constant 125 : i32
    %85 = tpu.dynamic_rotate %55 by %c125_i32 dim 1 : vector<16x128xf32>, i32 -> vector<16x128xf32>
    %c0_52 = arith.constant 0 : index
    %c6_53 = arith.constant 6 : index
    %86 = memref.load %arg3[%c0_52, %c6_53] : memref<7x7xf32, #tpu.memory_space<smem>>
    %87 = vector.broadcast %86 : f32 to vector<16x128xf32>
    %88 = arith.mulf %87, %85 : vector<16x128xf32>
    %89 = arith.addf %84, %88 : vector<16x128xf32>
    %c1_54 = arith.constant 1 : index
    %c0_55 = arith.constant 0 : index
    %90 = vector.load %arg7[%c1_54, %c0_55] : memref<24x128xf32, #tpu.memory_space<vmem>>, vector<16x128xf32>
    %c3_i32_56 = arith.constant 3 : i32
    %91 = tpu.dynamic_rotate %90 by %c3_i32_56 dim 1 : vector<16x128xf32>, i32 -> vector<16x128xf32>
    %c1_57 = arith.constant 1 : index
    %c0_58 = arith.constant 0 : index
    %92 = memref.load %arg3[%c1_57, %c0_58] : memref<7x7xf32, #tpu.memory_space<smem>>
    %93 = vector.broadcast %92 : f32 to vector<16x128xf32>
    %94 = arith.mulf %93, %91 : vector<16x128xf32>
    %95 = arith.addf %89, %94 : vector<16x128xf32>
    %c2_i32_59 = arith.constant 2 : i32
    %96 = tpu.dynamic_rotate %90 by %c2_i32_59 dim 1 : vector<16x128xf32>, i32 -> vector<16x128xf32>
    %c1_60 = arith.constant 1 : index
    %c1_61 = arith.constant 1 : index
    %97 = memref.load %arg3[%c1_60, %c1_61] : memref<7x7xf32, #tpu.memory_space<smem>>
    %98 = vector.broadcast %97 : f32 to vector<16x128xf32>
    %99 = arith.mulf %98, %96 : vector<16x128xf32>
    %100 = arith.addf %95, %99 : vector<16x128xf32>
    %c1_i32_62 = arith.constant 1 : i32
    %101 = tpu.dynamic_rotate %90 by %c1_i32_62 dim 1 : vector<16x128xf32>, i32 -> vector<16x128xf32>
    %c1_63 = arith.constant 1 : index
    %c2_64 = arith.constant 2 : index
    %102 = memref.load %arg3[%c1_63, %c2_64] : memref<7x7xf32, #tpu.memory_space<smem>>
    %103 = vector.broadcast %102 : f32 to vector<16x128xf32>
    %104 = arith.mulf %103, %101 : vector<16x128xf32>
    %105 = arith.addf %100, %104 : vector<16x128xf32>
    %c1_65 = arith.constant 1 : index
    %c3_66 = arith.constant 3 : index
    %106 = memref.load %arg3[%c1_65, %c3_66] : memref<7x7xf32, #tpu.memory_space<smem>>
    %107 = vector.broadcast %106 : f32 to vector<16x128xf32>
    %108 = arith.mulf %107, %90 : vector<16x128xf32>
    %109 = arith.addf %105, %108 : vector<16x128xf32>
    %c127_i32_67 = arith.constant 127 : i32
    %110 = tpu.dynamic_rotate %90 by %c127_i32_67 dim 1 : vector<16x128xf32>, i32 -> vector<16x128xf32>
    %c1_68 = arith.constant 1 : index
    %c4_69 = arith.constant 4 : index
    %111 = memref.load %arg3[%c1_68, %c4_69] : memref<7x7xf32, #tpu.memory_space<smem>>
    %112 = vector.broadcast %111 : f32 to vector<16x128xf32>
    %113 = arith.mulf %112, %110 : vector<16x128xf32>
    %114 = arith.addf %109, %113 : vector<16x128xf32>
    %c126_i32_70 = arith.constant 126 : i32
    %115 = tpu.dynamic_rotate %90 by %c126_i32_70 dim 1 : vector<16x128xf32>, i32 -> vector<16x128xf32>
    %c1_71 = arith.constant 1 : index
    %c5_72 = arith.constant 5 : index
    %116 = memref.load %arg3[%c1_71, %c5_72] : memref<7x7xf32, #tpu.memory_space<smem>>
    %117 = vector.broadcast %116 : f32 to vector<16x128xf32>
    %118 = arith.mulf %117, %115 : vector<16x128xf32>
    %119 = arith.addf %114, %118 : vector<16x128xf32>
    %c125_i32_73 = arith.constant 125 : i32
    %120 = tpu.dynamic_rotate %90 by %c125_i32_73 dim 1 : vector<16x128xf32>, i32 -> vector<16x128xf32>
    %c1_74 = arith.constant 1 : index
    %c6_75 = arith.constant 6 : index
    %121 = memref.load %arg3[%c1_74, %c6_75] : memref<7x7xf32, #tpu.memory_space<smem>>
    %122 = vector.broadcast %121 : f32 to vector<16x128xf32>
    %123 = arith.mulf %122, %120 : vector<16x128xf32>
    %124 = arith.addf %119, %123 : vector<16x128xf32>
    %c2_76 = arith.constant 2 : index
    %c0_77 = arith.constant 0 : index
    %125 = vector.load %arg7[%c2_76, %c0_77] : memref<24x128xf32, #tpu.memory_space<vmem>>, vector<16x128xf32>
    %c3_i32_78 = arith.constant 3 : i32
    %126 = tpu.dynamic_rotate %125 by %c3_i32_78 dim 1 : vector<16x128xf32>, i32 -> vector<16x128xf32>
    %c2_79 = arith.constant 2 : index
    %c0_80 = arith.constant 0 : index
    %127 = memref.load %arg3[%c2_79, %c0_80] : memref<7x7xf32, #tpu.memory_space<smem>>
    %128 = vector.broadcast %127 : f32 to vector<16x128xf32>
    %129 = arith.mulf %128, %126 : vector<16x128xf32>
    %130 = arith.addf %124, %129 : vector<16x128xf32>
    %c2_i32_81 = arith.constant 2 : i32
    %131 = tpu.dynamic_rotate %125 by %c2_i32_81 dim 1 : vector<16x128xf32>, i32 -> vector<16x128xf32>
    %c2_82 = arith.constant 2 : index
    %c1_83 = arith.constant 1 : index
    %132 = memref.load %arg3[%c2_82, %c1_83] : memref<7x7xf32, #tpu.memory_space<smem>>
    %133 = vector.broadcast %132 : f32 to vector<16x128xf32>
    %134 = arith.mulf %133, %131 : vector<16x128xf32>
    %135 = arith.addf %130, %134 : vector<16x128xf32>
    %c1_i32_84 = arith.constant 1 : i32
    %136 = tpu.dynamic_rotate %125 by %c1_i32_84 dim 1 : vector<16x128xf32>, i32 -> vector<16x128xf32>
    %c2_85 = arith.constant 2 : index
    %c2_86 = arith.constant 2 : index
    %137 = memref.load %arg3[%c2_85, %c2_86] : memref<7x7xf32, #tpu.memory_space<smem>>
    %138 = vector.broadcast %137 : f32 to vector<16x128xf32>
    %139 = arith.mulf %138, %136 : vector<16x128xf32>
    %140 = arith.addf %135, %139 : vector<16x128xf32>
    %c2_87 = arith.constant 2 : index
    %c3_88 = arith.constant 3 : index
    %141 = memref.load %arg3[%c2_87, %c3_88] : memref<7x7xf32, #tpu.memory_space<smem>>
    %142 = vector.broadcast %141 : f32 to vector<16x128xf32>
    %143 = arith.mulf %142, %125 : vector<16x128xf32>
    %144 = arith.addf %140, %143 : vector<16x128xf32>
    %c127_i32_89 = arith.constant 127 : i32
    %145 = tpu.dynamic_rotate %125 by %c127_i32_89 dim 1 : vector<16x128xf32>, i32 -> vector<16x128xf32>
    %c2_90 = arith.constant 2 : index
    %c4_91 = arith.constant 4 : index
    %146 = memref.load %arg3[%c2_90, %c4_91] : memref<7x7xf32, #tpu.memory_space<smem>>
    %147 = vector.broadcast %146 : f32 to vector<16x128xf32>
    %148 = arith.mulf %147, %145 : vector<16x128xf32>
    %149 = arith.addf %144, %148 : vector<16x128xf32>
    %c126_i32_92 = arith.constant 126 : i32
    %150 = tpu.dynamic_rotate %125 by %c126_i32_92 dim 1 : vector<16x128xf32>, i32 -> vector<16x128xf32>
    %c2_93 = arith.constant 2 : index
    %c5_94 = arith.constant 5 : index
    %151 = memref.load %arg3[%c2_93, %c5_94] : memref<7x7xf32, #tpu.memory_space<smem>>
    %152 = vector.broadcast %151 : f32 to vector<16x128xf32>
    %153 = arith.mulf %152, %150 : vector<16x128xf32>
    %154 = arith.addf %149, %153 : vector<16x128xf32>
    %c125_i32_95 = arith.constant 125 : i32
    %155 = tpu.dynamic_rotate %125 by %c125_i32_95 dim 1 : vector<16x128xf32>, i32 -> vector<16x128xf32>
    %c2_96 = arith.constant 2 : index
    %c6_97 = arith.constant 6 : index
    %156 = memref.load %arg3[%c2_96, %c6_97] : memref<7x7xf32, #tpu.memory_space<smem>>
    %157 = vector.broadcast %156 : f32 to vector<16x128xf32>
    %158 = arith.mulf %157, %155 : vector<16x128xf32>
    %159 = arith.addf %154, %158 : vector<16x128xf32>
    %c3_98 = arith.constant 3 : index
    %c0_99 = arith.constant 0 : index
    %160 = vector.load %arg7[%c3_98, %c0_99] : memref<24x128xf32, #tpu.memory_space<vmem>>, vector<16x128xf32>
    %c3_i32_100 = arith.constant 3 : i32
    %161 = tpu.dynamic_rotate %160 by %c3_i32_100 dim 1 : vector<16x128xf32>, i32 -> vector<16x128xf32>
    %c3_101 = arith.constant 3 : index
    %c0_102 = arith.constant 0 : index
    %162 = memref.load %arg3[%c3_101, %c0_102] : memref<7x7xf32, #tpu.memory_space<smem>>
    %163 = vector.broadcast %162 : f32 to vector<16x128xf32>
    %164 = arith.mulf %163, %161 : vector<16x128xf32>
    %165 = arith.addf %159, %164 : vector<16x128xf32>
    %c2_i32_103 = arith.constant 2 : i32
    %166 = tpu.dynamic_rotate %160 by %c2_i32_103 dim 1 : vector<16x128xf32>, i32 -> vector<16x128xf32>
    %c3_104 = arith.constant 3 : index
    %c1_105 = arith.constant 1 : index
    %167 = memref.load %arg3[%c3_104, %c1_105] : memref<7x7xf32, #tpu.memory_space<smem>>
    %168 = vector.broadcast %167 : f32 to vector<16x128xf32>
    %169 = arith.mulf %168, %166 : vector<16x128xf32>
    %170 = arith.addf %165, %169 : vector<16x128xf32>
    %c1_i32_106 = arith.constant 1 : i32
    %171 = tpu.dynamic_rotate %160 by %c1_i32_106 dim 1 : vector<16x128xf32>, i32 -> vector<16x128xf32>
    %c3_107 = arith.constant 3 : index
    %c2_108 = arith.constant 2 : index
    %172 = memref.load %arg3[%c3_107, %c2_108] : memref<7x7xf32, #tpu.memory_space<smem>>
    %173 = vector.broadcast %172 : f32 to vector<16x128xf32>
    %174 = arith.mulf %173, %171 : vector<16x128xf32>
    %175 = arith.addf %170, %174 : vector<16x128xf32>
    %c3_109 = arith.constant 3 : index
    %c3_110 = arith.constant 3 : index
    %176 = memref.load %arg3[%c3_109, %c3_110] : memref<7x7xf32, #tpu.memory_space<smem>>
    %177 = vector.broadcast %176 : f32 to vector<16x128xf32>
    %178 = arith.mulf %177, %160 : vector<16x128xf32>
    %179 = arith.addf %175, %178 : vector<16x128xf32>
    %c127_i32_111 = arith.constant 127 : i32
    %180 = tpu.dynamic_rotate %160 by %c127_i32_111 dim 1 : vector<16x128xf32>, i32 -> vector<16x128xf32>
    %c3_112 = arith.constant 3 : index
    %c4_113 = arith.constant 4 : index
    %181 = memref.load %arg3[%c3_112, %c4_113] : memref<7x7xf32, #tpu.memory_space<smem>>
    %182 = vector.broadcast %181 : f32 to vector<16x128xf32>
    %183 = arith.mulf %182, %180 : vector<16x128xf32>
    %184 = arith.addf %179, %183 : vector<16x128xf32>
    %c126_i32_114 = arith.constant 126 : i32
    %185 = tpu.dynamic_rotate %160 by %c126_i32_114 dim 1 : vector<16x128xf32>, i32 -> vector<16x128xf32>
    %c3_115 = arith.constant 3 : index
    %c5_116 = arith.constant 5 : index
    %186 = memref.load %arg3[%c3_115, %c5_116] : memref<7x7xf32, #tpu.memory_space<smem>>
    %187 = vector.broadcast %186 : f32 to vector<16x128xf32>
    %188 = arith.mulf %187, %185 : vector<16x128xf32>
    %189 = arith.addf %184, %188 : vector<16x128xf32>
    %c125_i32_117 = arith.constant 125 : i32
    %190 = tpu.dynamic_rotate %160 by %c125_i32_117 dim 1 : vector<16x128xf32>, i32 -> vector<16x128xf32>
    %c3_118 = arith.constant 3 : index
    %c6_119 = arith.constant 6 : index
    %191 = memref.load %arg3[%c3_118, %c6_119] : memref<7x7xf32, #tpu.memory_space<smem>>
    %192 = vector.broadcast %191 : f32 to vector<16x128xf32>
    %193 = arith.mulf %192, %190 : vector<16x128xf32>
    %194 = arith.addf %189, %193 : vector<16x128xf32>
    %c4_120 = arith.constant 4 : index
    %c0_121 = arith.constant 0 : index
    %195 = vector.load %arg7[%c4_120, %c0_121] : memref<24x128xf32, #tpu.memory_space<vmem>>, vector<16x128xf32>
    %c3_i32_122 = arith.constant 3 : i32
    %196 = tpu.dynamic_rotate %195 by %c3_i32_122 dim 1 : vector<16x128xf32>, i32 -> vector<16x128xf32>
    %c4_123 = arith.constant 4 : index
    %c0_124 = arith.constant 0 : index
    %197 = memref.load %arg3[%c4_123, %c0_124] : memref<7x7xf32, #tpu.memory_space<smem>>
    %198 = vector.broadcast %197 : f32 to vector<16x128xf32>
    %199 = arith.mulf %198, %196 : vector<16x128xf32>
    %200 = arith.addf %194, %199 : vector<16x128xf32>
    %c2_i32_125 = arith.constant 2 : i32
    %201 = tpu.dynamic_rotate %195 by %c2_i32_125 dim 1 : vector<16x128xf32>, i32 -> vector<16x128xf32>
    %c4_126 = arith.constant 4 : index
    %c1_127 = arith.constant 1 : index
    %202 = memref.load %arg3[%c4_126, %c1_127] : memref<7x7xf32, #tpu.memory_space<smem>>
    %203 = vector.broadcast %202 : f32 to vector<16x128xf32>
    %204 = arith.mulf %203, %201 : vector<16x128xf32>
    %205 = arith.addf %200, %204 : vector<16x128xf32>
    %c1_i32_128 = arith.constant 1 : i32
    %206 = tpu.dynamic_rotate %195 by %c1_i32_128 dim 1 : vector<16x128xf32>, i32 -> vector<16x128xf32>
    %c4_129 = arith.constant 4 : index
    %c2_130 = arith.constant 2 : index
    %207 = memref.load %arg3[%c4_129, %c2_130] : memref<7x7xf32, #tpu.memory_space<smem>>
    %208 = vector.broadcast %207 : f32 to vector<16x128xf32>
    %209 = arith.mulf %208, %206 : vector<16x128xf32>
    %210 = arith.addf %205, %209 : vector<16x128xf32>
    %c4_131 = arith.constant 4 : index
    %c3_132 = arith.constant 3 : index
    %211 = memref.load %arg3[%c4_131, %c3_132] : memref<7x7xf32, #tpu.memory_space<smem>>
    %212 = vector.broadcast %211 : f32 to vector<16x128xf32>
    %213 = arith.mulf %212, %195 : vector<16x128xf32>
    %214 = arith.addf %210, %213 : vector<16x128xf32>
    %c127_i32_133 = arith.constant 127 : i32
    %215 = tpu.dynamic_rotate %195 by %c127_i32_133 dim 1 : vector<16x128xf32>, i32 -> vector<16x128xf32>
    %c4_134 = arith.constant 4 : index
    %c4_135 = arith.constant 4 : index
    %216 = memref.load %arg3[%c4_134, %c4_135] : memref<7x7xf32, #tpu.memory_space<smem>>
    %217 = vector.broadcast %216 : f32 to vector<16x128xf32>
    %218 = arith.mulf %217, %215 : vector<16x128xf32>
    %219 = arith.addf %214, %218 : vector<16x128xf32>
    %c126_i32_136 = arith.constant 126 : i32
    %220 = tpu.dynamic_rotate %195 by %c126_i32_136 dim 1 : vector<16x128xf32>, i32 -> vector<16x128xf32>
    %c4_137 = arith.constant 4 : index
    %c5_138 = arith.constant 5 : index
    %221 = memref.load %arg3[%c4_137, %c5_138] : memref<7x7xf32, #tpu.memory_space<smem>>
    %222 = vector.broadcast %221 : f32 to vector<16x128xf32>
    %223 = arith.mulf %222, %220 : vector<16x128xf32>
    %224 = arith.addf %219, %223 : vector<16x128xf32>
    %c125_i32_139 = arith.constant 125 : i32
    %225 = tpu.dynamic_rotate %195 by %c125_i32_139 dim 1 : vector<16x128xf32>, i32 -> vector<16x128xf32>
    %c4_140 = arith.constant 4 : index
    %c6_141 = arith.constant 6 : index
    %226 = memref.load %arg3[%c4_140, %c6_141] : memref<7x7xf32, #tpu.memory_space<smem>>
    %227 = vector.broadcast %226 : f32 to vector<16x128xf32>
    %228 = arith.mulf %227, %225 : vector<16x128xf32>
    %229 = arith.addf %224, %228 : vector<16x128xf32>
    %c5_142 = arith.constant 5 : index
    %c0_143 = arith.constant 0 : index
    %230 = vector.load %arg7[%c5_142, %c0_143] : memref<24x128xf32, #tpu.memory_space<vmem>>, vector<16x128xf32>
    %c3_i32_144 = arith.constant 3 : i32
    %231 = tpu.dynamic_rotate %230 by %c3_i32_144 dim 1 : vector<16x128xf32>, i32 -> vector<16x128xf32>
    %c5_145 = arith.constant 5 : index
    %c0_146 = arith.constant 0 : index
    %232 = memref.load %arg3[%c5_145, %c0_146] : memref<7x7xf32, #tpu.memory_space<smem>>
    %233 = vector.broadcast %232 : f32 to vector<16x128xf32>
    %234 = arith.mulf %233, %231 : vector<16x128xf32>
    %235 = arith.addf %229, %234 : vector<16x128xf32>
    %c2_i32_147 = arith.constant 2 : i32
    %236 = tpu.dynamic_rotate %230 by %c2_i32_147 dim 1 : vector<16x128xf32>, i32 -> vector<16x128xf32>
    %c5_148 = arith.constant 5 : index
    %c1_149 = arith.constant 1 : index
    %237 = memref.load %arg3[%c5_148, %c1_149] : memref<7x7xf32, #tpu.memory_space<smem>>
    %238 = vector.broadcast %237 : f32 to vector<16x128xf32>
    %239 = arith.mulf %238, %236 : vector<16x128xf32>
    %240 = arith.addf %235, %239 : vector<16x128xf32>
    %c1_i32_150 = arith.constant 1 : i32
    %241 = tpu.dynamic_rotate %230 by %c1_i32_150 dim 1 : vector<16x128xf32>, i32 -> vector<16x128xf32>
    %c5_151 = arith.constant 5 : index
    %c2_152 = arith.constant 2 : index
    %242 = memref.load %arg3[%c5_151, %c2_152] : memref<7x7xf32, #tpu.memory_space<smem>>
    %243 = vector.broadcast %242 : f32 to vector<16x128xf32>
    %244 = arith.mulf %243, %241 : vector<16x128xf32>
    %245 = arith.addf %240, %244 : vector<16x128xf32>
    %c5_153 = arith.constant 5 : index
    %c3_154 = arith.constant 3 : index
    %246 = memref.load %arg3[%c5_153, %c3_154] : memref<7x7xf32, #tpu.memory_space<smem>>
    %247 = vector.broadcast %246 : f32 to vector<16x128xf32>
    %248 = arith.mulf %247, %230 : vector<16x128xf32>
    %249 = arith.addf %245, %248 : vector<16x128xf32>
    %c127_i32_155 = arith.constant 127 : i32
    %250 = tpu.dynamic_rotate %230 by %c127_i32_155 dim 1 : vector<16x128xf32>, i32 -> vector<16x128xf32>
    %c5_156 = arith.constant 5 : index
    %c4_157 = arith.constant 4 : index
    %251 = memref.load %arg3[%c5_156, %c4_157] : memref<7x7xf32, #tpu.memory_space<smem>>
    %252 = vector.broadcast %251 : f32 to vector<16x128xf32>
    %253 = arith.mulf %252, %250 : vector<16x128xf32>
    %254 = arith.addf %249, %253 : vector<16x128xf32>
    %c126_i32_158 = arith.constant 126 : i32
    %255 = tpu.dynamic_rotate %230 by %c126_i32_158 dim 1 : vector<16x128xf32>, i32 -> vector<16x128xf32>
    %c5_159 = arith.constant 5 : index
    %c5_160 = arith.constant 5 : index
    %256 = memref.load %arg3[%c5_159, %c5_160] : memref<7x7xf32, #tpu.memory_space<smem>>
    %257 = vector.broadcast %256 : f32 to vector<16x128xf32>
    %258 = arith.mulf %257, %255 : vector<16x128xf32>
    %259 = arith.addf %254, %258 : vector<16x128xf32>
    %c125_i32_161 = arith.constant 125 : i32
    %260 = tpu.dynamic_rotate %230 by %c125_i32_161 dim 1 : vector<16x128xf32>, i32 -> vector<16x128xf32>
    %c5_162 = arith.constant 5 : index
    %c6_163 = arith.constant 6 : index
    %261 = memref.load %arg3[%c5_162, %c6_163] : memref<7x7xf32, #tpu.memory_space<smem>>
    %262 = vector.broadcast %261 : f32 to vector<16x128xf32>
    %263 = arith.mulf %262, %260 : vector<16x128xf32>
    %264 = arith.addf %259, %263 : vector<16x128xf32>
    %c6_164 = arith.constant 6 : index
    %c0_165 = arith.constant 0 : index
    %265 = vector.load %arg7[%c6_164, %c0_165] : memref<24x128xf32, #tpu.memory_space<vmem>>, vector<16x128xf32>
    %c3_i32_166 = arith.constant 3 : i32
    %266 = tpu.dynamic_rotate %265 by %c3_i32_166 dim 1 : vector<16x128xf32>, i32 -> vector<16x128xf32>
    %c6_167 = arith.constant 6 : index
    %c0_168 = arith.constant 0 : index
    %267 = memref.load %arg3[%c6_167, %c0_168] : memref<7x7xf32, #tpu.memory_space<smem>>
    %268 = vector.broadcast %267 : f32 to vector<16x128xf32>
    %269 = arith.mulf %268, %266 : vector<16x128xf32>
    %270 = arith.addf %264, %269 : vector<16x128xf32>
    %c2_i32_169 = arith.constant 2 : i32
    %271 = tpu.dynamic_rotate %265 by %c2_i32_169 dim 1 : vector<16x128xf32>, i32 -> vector<16x128xf32>
    %c6_170 = arith.constant 6 : index
    %c1_171 = arith.constant 1 : index
    %272 = memref.load %arg3[%c6_170, %c1_171] : memref<7x7xf32, #tpu.memory_space<smem>>
    %273 = vector.broadcast %272 : f32 to vector<16x128xf32>
    %274 = arith.mulf %273, %271 : vector<16x128xf32>
    %275 = arith.addf %270, %274 : vector<16x128xf32>
    %c1_i32_172 = arith.constant 1 : i32
    %276 = tpu.dynamic_rotate %265 by %c1_i32_172 dim 1 : vector<16x128xf32>, i32 -> vector<16x128xf32>
    %c6_173 = arith.constant 6 : index
    %c2_174 = arith.constant 2 : index
    %277 = memref.load %arg3[%c6_173, %c2_174] : memref<7x7xf32, #tpu.memory_space<smem>>
    %278 = vector.broadcast %277 : f32 to vector<16x128xf32>
    %279 = arith.mulf %278, %276 : vector<16x128xf32>
    %280 = arith.addf %275, %279 : vector<16x128xf32>
    %c6_175 = arith.constant 6 : index
    %c3_176 = arith.constant 3 : index
    %281 = memref.load %arg3[%c6_175, %c3_176] : memref<7x7xf32, #tpu.memory_space<smem>>
    %282 = vector.broadcast %281 : f32 to vector<16x128xf32>
    %283 = arith.mulf %282, %265 : vector<16x128xf32>
    %284 = arith.addf %280, %283 : vector<16x128xf32>
    %c127_i32_177 = arith.constant 127 : i32
    %285 = tpu.dynamic_rotate %265 by %c127_i32_177 dim 1 : vector<16x128xf32>, i32 -> vector<16x128xf32>
    %c6_178 = arith.constant 6 : index
    %c4_179 = arith.constant 4 : index
    %286 = memref.load %arg3[%c6_178, %c4_179] : memref<7x7xf32, #tpu.memory_space<smem>>
    %287 = vector.broadcast %286 : f32 to vector<16x128xf32>
    %288 = arith.mulf %287, %285 : vector<16x128xf32>
    %289 = arith.addf %284, %288 : vector<16x128xf32>
    %c126_i32_180 = arith.constant 126 : i32
    %290 = tpu.dynamic_rotate %265 by %c126_i32_180 dim 1 : vector<16x128xf32>, i32 -> vector<16x128xf32>
    %c6_181 = arith.constant 6 : index
    %c5_182 = arith.constant 5 : index
    %291 = memref.load %arg3[%c6_181, %c5_182] : memref<7x7xf32, #tpu.memory_space<smem>>
    %292 = vector.broadcast %291 : f32 to vector<16x128xf32>
    %293 = arith.mulf %292, %290 : vector<16x128xf32>
    %294 = arith.addf %289, %293 : vector<16x128xf32>
    %c125_i32_183 = arith.constant 125 : i32
    %295 = tpu.dynamic_rotate %265 by %c125_i32_183 dim 1 : vector<16x128xf32>, i32 -> vector<16x128xf32>
    %c6_184 = arith.constant 6 : index
    %c6_185 = arith.constant 6 : index
    %296 = memref.load %arg3[%c6_184, %c6_185] : memref<7x7xf32, #tpu.memory_space<smem>>
    %297 = vector.broadcast %296 : f32 to vector<16x128xf32>
    %298 = arith.mulf %297, %295 : vector<16x128xf32>
    %299 = arith.addf %294, %298 : vector<16x128xf32>
    %300 = vector.extract_strided_slice %299 {offsets = [0, 0], sizes = [16, 16], strides = [1, 1]} : vector<16x128xf32> to vector<16x16xf32>
    %301 = arith.negf %300 : vector<16x16xf32>
    %302 = math.exp %301 : vector<16x16xf32>
    %cst_186 = arith.constant 1.000000e+00 : f32
    %303 = vector.broadcast %cst_186 : f32 to vector<16x16xf32>
    %304 = arith.addf %303, %302 : vector<16x16xf32>
    %305 = arith.divf %303, %304 : vector<16x16xf32>
    %c0_187 = arith.constant 0 : index
    %c0_188 = arith.constant 0 : index
    %c0_189 = arith.constant 0 : index
    %c0_190 = arith.constant 0 : index
    %306 = vector.load %arg5[%c0_187, %c0_188, %c0_189, %c0_190] : memref<1x8x16x16xf32, #tpu.memory_space<vmem>>, vector<1x1x16x16xf32>
    %307 = vector.shape_cast %306 : vector<1x1x16x16xf32> to vector<16x16xf32>
    %308 = arith.mulf %307, %305 : vector<16x16xf32>
    %309 = arith.index_cast %arg0 : i32 to index
    %c0_191 = arith.constant 0 : index
    %310 = memref.load %arg4[%309, %c0_191] : memref<2x8xf32, #tpu.memory_space<smem>>
    %311 = vector.broadcast %310 : f32 to vector<16x16xf32>
    %312 = arith.mulf %308, %311 : vector<16x16xf32>
    %c0_192 = arith.constant 0 : index
    %c0_193 = arith.constant 0 : index
    %c0_194 = arith.constant 0 : index
    %c0_195 = arith.constant 0 : index
    %313 = vector.load %arg6[%c0_192, %c0_193, %c0_194, %c0_195] : memref<1x8x16x16xf32, #tpu.memory_space<vmem>>, vector<1x1x16x16xf32>
    %314 = vector.shape_cast %313 : vector<1x1x16x16xf32> to vector<16x16xf32>
    %315 = vector.shape_cast %312 : vector<16x16xf32> to vector<1x1x16x16xf32>
    tpu.vector_store %arg6[%c0_192, %c0_193, %c0_194, %c0_195], %315 {strides = array<i32>} : memref<1x8x16x16xf32, #tpu.memory_space<vmem>>, vector<1x1x16x16xf32>,
    %c0_196 = arith.constant 0 : index
    %c1_197 = arith.constant 1 : index
    %c0_198 = arith.constant 0 : index
    %c0_199 = arith.constant 0 : index
    %316 = vector.load %arg5[%c0_196, %c1_197, %c0_198, %c0_199] : memref<1x8x16x16xf32, #tpu.memory_space<vmem>>, vector<1x1x16x16xf32>
    %317 = vector.shape_cast %316 : vector<1x1x16x16xf32> to vector<16x16xf32>
    %318 = arith.mulf %317, %305 : vector<16x16xf32>
    %319 = arith.index_cast %arg0 : i32 to index
    %c1_200 = arith.constant 1 : index
    %320 = memref.load %arg4[%319, %c1_200] : memref<2x8xf32, #tpu.memory_space<smem>>
    %321 = vector.broadcast %320 : f32 to vector<16x16xf32>
    %322 = arith.mulf %318, %321 : vector<16x16xf32>
    %c0_201 = arith.constant 0 : index
    %c1_202 = arith.constant 1 : index
    %c0_203 = arith.constant 0 : index
    %c0_204 = arith.constant 0 : index
    %323 = vector.load %arg6[%c0_201, %c1_202, %c0_203, %c0_204] : memref<1x8x16x16xf32, #tpu.memory_space<vmem>>, vector<1x1x16x16xf32>
    %324 = vector.shape_cast %323 : vector<1x1x16x16xf32> to vector<16x16xf32>
    %325 = vector.shape_cast %322 : vector<16x16xf32> to vector<1x1x16x16xf32>
    tpu.vector_store %arg6[%c0_201, %c1_202, %c0_203, %c0_204], %325 {strides = array<i32>} : memref<1x8x16x16xf32, #tpu.memory_space<vmem>>, vector<1x1x16x16xf32>,
    %c0_205 = arith.constant 0 : index
    %c2_206 = arith.constant 2 : index
    %c0_207 = arith.constant 0 : index
    %c0_208 = arith.constant 0 : index
    %326 = vector.load %arg5[%c0_205, %c2_206, %c0_207, %c0_208] : memref<1x8x16x16xf32, #tpu.memory_space<vmem>>, vector<1x1x16x16xf32>
    %327 = vector.shape_cast %326 : vector<1x1x16x16xf32> to vector<16x16xf32>
    %328 = arith.mulf %327, %305 : vector<16x16xf32>
    %329 = arith.index_cast %arg0 : i32 to index
    %c2_209 = arith.constant 2 : index
    %330 = memref.load %arg4[%329, %c2_209] : memref<2x8xf32, #tpu.memory_space<smem>>
    %331 = vector.broadcast %330 : f32 to vector<16x16xf32>
    %332 = arith.mulf %328, %331 : vector<16x16xf32>
    %c0_210 = arith.constant 0 : index
    %c2_211 = arith.constant 2 : index
    %c0_212 = arith.constant 0 : index
    %c0_213 = arith.constant 0 : index
    %333 = vector.load %arg6[%c0_210, %c2_211, %c0_212, %c0_213] : memref<1x8x16x16xf32, #tpu.memory_space<vmem>>, vector<1x1x16x16xf32>
    %334 = vector.shape_cast %333 : vector<1x1x16x16xf32> to vector<16x16xf32>
    %335 = vector.shape_cast %332 : vector<16x16xf32> to vector<1x1x16x16xf32>
    tpu.vector_store %arg6[%c0_210, %c2_211, %c0_212, %c0_213], %335 {strides = array<i32>} : memref<1x8x16x16xf32, #tpu.memory_space<vmem>>, vector<1x1x16x16xf32>,
    %c0_214 = arith.constant 0 : index
    %c3_215 = arith.constant 3 : index
    %c0_216 = arith.constant 0 : index
    %c0_217 = arith.constant 0 : index
    %336 = vector.load %arg5[%c0_214, %c3_215, %c0_216, %c0_217] : memref<1x8x16x16xf32, #tpu.memory_space<vmem>>, vector<1x1x16x16xf32>
    %337 = vector.shape_cast %336 : vector<1x1x16x16xf32> to vector<16x16xf32>
    %338 = arith.mulf %337, %305 : vector<16x16xf32>
    %339 = arith.index_cast %arg0 : i32 to index
    %c3_218 = arith.constant 3 : index
    %340 = memref.load %arg4[%339, %c3_218] : memref<2x8xf32, #tpu.memory_space<smem>>
    %341 = vector.broadcast %340 : f32 to vector<16x16xf32>
    %342 = arith.mulf %338, %341 : vector<16x16xf32>
    %c0_219 = arith.constant 0 : index
    %c3_220 = arith.constant 3 : index
    %c0_221 = arith.constant 0 : index
    %c0_222 = arith.constant 0 : index
    %343 = vector.load %arg6[%c0_219, %c3_220, %c0_221, %c0_222] : memref<1x8x16x16xf32, #tpu.memory_space<vmem>>, vector<1x1x16x16xf32>
    %344 = vector.shape_cast %343 : vector<1x1x16x16xf32> to vector<16x16xf32>
    %345 = vector.shape_cast %342 : vector<16x16xf32> to vector<1x1x16x16xf32>
    tpu.vector_store %arg6[%c0_219, %c3_220, %c0_221, %c0_222], %345 {strides = array<i32>} : memref<1x8x16x16xf32, #tpu.memory_space<vmem>>, vector<1x1x16x16xf32>,
    %c0_223 = arith.constant 0 : index
    %c4_224 = arith.constant 4 : index
    %c0_225 = arith.constant 0 : index
    %c0_226 = arith.constant 0 : index
    %346 = vector.load %arg5[%c0_223, %c4_224, %c0_225, %c0_226] : memref<1x8x16x16xf32, #tpu.memory_space<vmem>>, vector<1x1x16x16xf32>
    %347 = vector.shape_cast %346 : vector<1x1x16x16xf32> to vector<16x16xf32>
    %348 = arith.mulf %347, %305 : vector<16x16xf32>
    %349 = arith.index_cast %arg0 : i32 to index
    %c4_227 = arith.constant 4 : index
    %350 = memref.load %arg4[%349, %c4_227] : memref<2x8xf32, #tpu.memory_space<smem>>
    %351 = vector.broadcast %350 : f32 to vector<16x16xf32>
    %352 = arith.mulf %348, %351 : vector<16x16xf32>
    %c0_228 = arith.constant 0 : index
    %c4_229 = arith.constant 4 : index
    %c0_230 = arith.constant 0 : index
    %c0_231 = arith.constant 0 : index
    %353 = vector.load %arg6[%c0_228, %c4_229, %c0_230, %c0_231] : memref<1x8x16x16xf32, #tpu.memory_space<vmem>>, vector<1x1x16x16xf32>
    %354 = vector.shape_cast %353 : vector<1x1x16x16xf32> to vector<16x16xf32>
    %355 = vector.shape_cast %352 : vector<16x16xf32> to vector<1x1x16x16xf32>
    tpu.vector_store %arg6[%c0_228, %c4_229, %c0_230, %c0_231], %355 {strides = array<i32>} : memref<1x8x16x16xf32, #tpu.memory_space<vmem>>, vector<1x1x16x16xf32>,
    %c0_232 = arith.constant 0 : index
    %c5_233 = arith.constant 5 : index
    %c0_234 = arith.constant 0 : index
    %c0_235 = arith.constant 0 : index
    %356 = vector.load %arg5[%c0_232, %c5_233, %c0_234, %c0_235] : memref<1x8x16x16xf32, #tpu.memory_space<vmem>>, vector<1x1x16x16xf32>
    %357 = vector.shape_cast %356 : vector<1x1x16x16xf32> to vector<16x16xf32>
    %358 = arith.mulf %357, %305 : vector<16x16xf32>
    %359 = arith.index_cast %arg0 : i32 to index
    %c5_236 = arith.constant 5 : index
    %360 = memref.load %arg4[%359, %c5_236] : memref<2x8xf32, #tpu.memory_space<smem>>
    %361 = vector.broadcast %360 : f32 to vector<16x16xf32>
    %362 = arith.mulf %358, %361 : vector<16x16xf32>
    %c0_237 = arith.constant 0 : index
    %c5_238 = arith.constant 5 : index
    %c0_239 = arith.constant 0 : index
    %c0_240 = arith.constant 0 : index
    %363 = vector.load %arg6[%c0_237, %c5_238, %c0_239, %c0_240] : memref<1x8x16x16xf32, #tpu.memory_space<vmem>>, vector<1x1x16x16xf32>
    %364 = vector.shape_cast %363 : vector<1x1x16x16xf32> to vector<16x16xf32>
    %365 = vector.shape_cast %362 : vector<16x16xf32> to vector<1x1x16x16xf32>
    tpu.vector_store %arg6[%c0_237, %c5_238, %c0_239, %c0_240], %365 {strides = array<i32>} : memref<1x8x16x16xf32, #tpu.memory_space<vmem>>, vector<1x1x16x16xf32>,
    %c0_241 = arith.constant 0 : index
    %c6_242 = arith.constant 6 : index
    %c0_243 = arith.constant 0 : index
    %c0_244 = arith.constant 0 : index
    %366 = vector.load %arg5[%c0_241, %c6_242, %c0_243, %c0_244] : memref<1x8x16x16xf32, #tpu.memory_space<vmem>>, vector<1x1x16x16xf32>
    %367 = vector.shape_cast %366 : vector<1x1x16x16xf32> to vector<16x16xf32>
    %368 = arith.mulf %367, %305 : vector<16x16xf32>
    %369 = arith.index_cast %arg0 : i32 to index
    %c6_245 = arith.constant 6 : index
    %370 = memref.load %arg4[%369, %c6_245] : memref<2x8xf32, #tpu.memory_space<smem>>
    %371 = vector.broadcast %370 : f32 to vector<16x16xf32>
    %372 = arith.mulf %368, %371 : vector<16x16xf32>
    %c0_246 = arith.constant 0 : index
    %c6_247 = arith.constant 6 : index
    %c0_248 = arith.constant 0 : index
    %c0_249 = arith.constant 0 : index
    %373 = vector.load %arg6[%c0_246, %c6_247, %c0_248, %c0_249] : memref<1x8x16x16xf32, #tpu.memory_space<vmem>>, vector<1x1x16x16xf32>
    %374 = vector.shape_cast %373 : vector<1x1x16x16xf32> to vector<16x16xf32>
    %375 = vector.shape_cast %372 : vector<16x16xf32> to vector<1x1x16x16xf32>
    tpu.vector_store %arg6[%c0_246, %c6_247, %c0_248, %c0_249], %375 {strides = array<i32>} : memref<1x8x16x16xf32, #tpu.memory_space<vmem>>, vector<1x1x16x16xf32>,
    %c0_250 = arith.constant 0 : index
    %c7_251 = arith.constant 7 : index
    %c0_252 = arith.constant 0 : index
    %c0_253 = arith.constant 0 : index
    %376 = vector.load %arg5[%c0_250, %c7_251, %c0_252, %c0_253] : memref<1x8x16x16xf32, #tpu.memory_space<vmem>>, vector<1x1x16x16xf32>
    %377 = vector.shape_cast %376 : vector<1x1x16x16xf32> to vector<16x16xf32>
    %378 = arith.mulf %377, %305 : vector<16x16xf32>
    %379 = arith.index_cast %arg0 : i32 to index
    %c7_254 = arith.constant 7 : index
    %380 = memref.load %arg4[%379, %c7_254] : memref<2x8xf32, #tpu.memory_space<smem>>
    %381 = vector.broadcast %380 : f32 to vector<16x16xf32>
    %382 = arith.mulf %378, %381 : vector<16x16xf32>
    %c0_255 = arith.constant 0 : index
    %c7_256 = arith.constant 7 : index
    %c0_257 = arith.constant 0 : index
    %c0_258 = arith.constant 0 : index
    %383 = vector.load %arg6[%c0_255, %c7_256, %c0_257, %c0_258] : memref<1x8x16x16xf32, #tpu.memory_space<vmem>>, vector<1x1x16x16xf32>
    %384 = vector.shape_cast %383 : vector<1x1x16x16xf32> to vector<16x16xf32>
    %385 = vector.shape_cast %382 : vector<16x16xf32> to vector<1x1x16x16xf32>
    tpu.vector_store %arg6[%c0_255, %c7_256, %c0_257, %c0_258], %385 {strides = array<i32>} : memref<1x8x16x16xf32, #tpu.memory_space<vmem>>, vector<1x1x16x16xf32>,
    return
  }
  func.func @transform_0(%arg0: i32, %arg1: memref<2xf32, #tpu.memory_space<smem>>, %arg2: memref<8xf32, #tpu.memory_space<smem>>, %arg3: memref<7x7xf32, #tpu.memory_space<smem>>, %arg4: memref<2x8xf32, #tpu.memory_space<smem>>) -> (i32, i32, i32, i32) {
    %c0_i32 = arith.constant 0 : i32
    %c0_i32_0 = arith.constant 0 : i32
    %c0_i32_1 = arith.constant 0 : i32
    %c0_i32_2 = arith.constant 0 : i32
    return %arg0, %c0_i32, %c0_i32_0, %c0_i32_1 : i32, i32, i32, i32
  }
  func.func @transform_1(%arg0: i32, %arg1: memref<2xf32, #tpu.memory_space<smem>>, %arg2: memref<8xf32, #tpu.memory_space<smem>>, %arg3: memref<7x7xf32, #tpu.memory_space<smem>>, %arg4: memref<2x8xf32, #tpu.memory_space<smem>>) -> (i32, i32, i32, i32) {
    %c0_i32 = arith.constant 0 : i32
    %c0_i32_0 = arith.constant 0 : i32
    %c0_i32_1 = arith.constant 0 : i32
    %c0_i32_2 = arith.constant 0 : i32
    return %arg0, %c0_i32, %c0_i32_0, %c0_i32_1 : i32, i32, i32, i32
  }
}

</mosaic_0001>

<bundles_post_ra>
// kernel: decoder_att_forward.1
= control target key start
LH: loop header
LB: loop body
LE: loop exit
PB: predicated region body
PF: predicated region fallthrough
CT: control target
= control target key end

     0   :  { %s1862_s0 = inlined_call_operand.hbm [shape: f32[2], index: 0, kind: input, shape index: {}]   ;;  %s1863_s4 = inlined_call_operand.hbm [shape: f32[2,8,16,16], index: 4, kind: input, shape index: {}]   ;;  %s1864_s5 = inlined_call_operand.hbm [shape: f32[2,8,16,16], index: 5, kind: output, shape index: {}]   ;;  %s1865_s1 = inlined_call_operand.hbm [shape: f32[8], index: 1, kind: input, shape index: {}]   ;;  %s1866_s2 = inlined_call_operand.hbm [shape: f32[7,7], index: 2, kind: input, shape index: {}]   ;;  %s1867_s3 = inlined_call_operand.hbm [shape: f32[2,8], index: 3, kind: input, shape index: {}]  }
   0x1   :  { %s1086_s20 = scalar_lea.hbm %s1862_s0, 16 }
   0x2   :  { %p1087_p0 = scmp.ne.s32.totalorder %s1862_s0, %s1086_s20  ;;  %p1090_p1 = scmp.lt.u32.totalorder %s1086_s20, %s1862_s0 }
   0x4   :  { %p1092_p2 = pnand %p1090_p1, %p1087_p0 }
   0x6   :  { %1095 = shalt.err (!%p1092_p2)  }
   0x7   :  { %s1226_s25 = smov [#allocation4]   ;;  %s1096_s30 = scalar_lea.hbm %s1865_s1, 16 }
   0x8   :  { %11 = dma.hbm_to_smem %s1862_s0, 16, %s1226_s25, [#allocation3] }
   0x9   :  { %p1097_p3 = scmp.ne.s32.totalorder %s1865_s1, %s1096_s30  ;;  %p1100_p4 = scmp.lt.u32.totalorder %s1096_s30, %s1865_s1 }
   0xb   :  { %p1102_p5 = pnand %p1100_p4, %p1097_p3 }
   0xd   :  { %1105 = shalt.err (!%p1102_p5)  }
   0xe   :  { %s1227_s10 = smov [#allocation5]   ;;  %s1106_s14 = scalar_lea.hbm %s1866_s2, 128 }
   0xf   :  { %13 = dma.hbm_to_smem %s1865_s1, 16, %s1227_s10, [#allocation3] }
  0x10   :  { %p1107_p6 = scmp.ne.s32.totalorder %s1866_s2, %s1106_s14  ;;  %p1110_p7 = scmp.lt.u32.totalorder %s1106_s14, %s1866_s2 }
  0x12   :  { %p1112_p8 = pnand %p1110_p7, %p1107_p6 }
  0x14   :  { %1115 = shalt.err (!%p1112_p8)  }
  0x15   :  { %s1228_s19 = smov [#allocation6]   ;;  %s1116_s23 = scalar_lea.hbm %s1867_s3, 32 }
  0x16   :  { %15 = dma.hbm_to_smem %s1866_s2, 128, %s1228_s19, [#allocation3] }
  0x17   :  { %p1117_p9 = scmp.ne.s32.totalorder %s1867_s3, %s1116_s23  ;;  %p1120_p10 = scmp.lt.u32.totalorder %s1116_s23, %s1867_s3 }
  0x19   :  { %p1122_p11 = pnand %p1120_p10, %p1117_p9 }
  0x1b   :  { %1125 = shalt.err (!%p1122_p11)  }
  0x1c   :  { %s1229_s28 = smov [#allocation7]  }
  0x1d   :  { %17 = dma.hbm_to_smem %s1867_s3, 32, %s1229_s28, [#allocation3] }
  0x1e   :  { %1200 = dma.done.wait [#allocation3], 192 }
  0x1f   :  { %1201 = vsyncadd [#allocation3], 4294967104 }
  0x20   :  { %19 = sfence }
  0x21   :  { %20 = vsyncpa [#allocation9], 0 }
  0x22   :  { %22 = vsyncpa [#allocation9 + $0x1], 0 }
  0x23   :  { %23 = vsyncpa [#allocation10], 0 }
  0x24   :  { %25 = vsyncpa [#allocation10 + $0x1], 0  ;;  %s1321_s2 = smov 0   ;;  %s1323_s6 = smov 0  }
  0x25   :  { %s1325_s7 = smov 0   ;;  %s1327_s8 = smov 0  }
  0x26 LB: > { %s1342_s3 = sadd.s32 4294967295, %s1224_s8   ;;  %s900_s9 = sadd.s32 4294967294, %s1224_s8   ;;  %s1224_s8 = sphi %s1327_s8, %s1880_s8   ;;  %s1220_s7 = sphi %s1325_s7, %s1879_s7   ;;  %s1216_s6 = sphi %s1323_s6, %s1878_s6   ;;  %s1212_s2 = sphi %s1321_s2, %s1877_s2  }
  0x27   : > { %s1346_s10 = sadd.s32 1, %s1224_s8   ;;  %s38_s11 = sadd.s32 1, %s1220_s7 }
  0x28   : > { %s35_s12 = ssub.s32 %s1224_s8, %s1346_s10  ;;  %p45_p12 = scmp.ne.s32.totalorder %s1220_s7, %s1216_s6 }
  0x29   : > { %p36_p13 = scmp.eq.s32.totalorder %s35_s12, 0  ;;  %p46_p0 = scmp.eq.s32.totalorder %s1224_s8, 0 }
  0x2a   : > { %p51_p1 = scmp.ne.s32.totalorder %s1216_s6, %s1212_s2  ;;  %p52_p2 = scmp.eq.s32.totalorder %s1342_s3, 0 }
  0x2b   : > { %s1358_s0 = scalar_select %p36_p13, %s1220_s7, %s38_s11  }
  0x2c   : > { %p1360_p3 = por %p46_p0, %p45_p12  ;;  %p1364_p4 = por %p52_p2, %p51_p1 }
  0x2d   : > { %p75_p5 = scmp.eq.s32.totalorder %s1342_s3, 1  ;;  %p81_p6 = scmp.eq.s32.totalorder %s900_s9, 1 }
  0x2e   : > { %p1029_p8 = scmp.lt.s32.totalorder %s1224_s8, 2  ;;  %s101_s17 = sand.u32 1, %s1220_s7  }
  0x2f   : > { %p1371_p9 = por %p75_p5, %p45_p12  ;;  %p1375_p10 = por %p81_p6, %p51_p1 }
  0x30   : > { %s1015_s18 = sshll.u32 %s1224_s8, 11  ;;  %s903_s19 = sshll.u32 %s101_s17, 7 }
  0x31   : > { %s1871_s15 = scalar_select %p1371_p9, 1, 0 }
  0x32   : > { %s1872_s16 = scalar_select %p1375_p10, 1, 0 }
  0x33   : > { %s1384_s1 = scalar_lea.hbm %s1863_s4, %s1015_s18  ;;  %s105_s22 = scalar_lea.vmem [#allocation8], %s903_s19 }
  0x34   : > { %s112_s23 = sshll.u32 %s105_s22, 4  ;;  %p1388_p11 = pnand %p1029_p8, %p1360_p3  ;;  %s1392_s23 = int_to_ptr.vmem [resolvable:$true] %s112_s23 }
  0x35   : > { %s1394_s25 = scalar_lea.sflag [#allocation9], %s101_s17  ;;  %s1126_s26 = scalar_lea.hbm %s1384_s1, 2048 }
  0x36   : > { %p1127_p12 = scmp.ne.s32.totalorder %s1384_s1, %s1126_s26  ;;  %p1128_p13 = pneg %p1388_p11 }
  0x37   : > { %s1131_s29 = scalar_lea.hbm %s1863_s4, 4096  ;;  %p1132_p2 = scmp.lt.u32.totalorder %s1384_s1, %s1863_s4 }
  0x38   : > { %p1129_p0 = pnand %p1128_p13, %p1127_p12  ;;  %p1133_p3 = scmp.lt.u32.totalorder %s1131_s29, %s1126_s26 }
  0x39   : > { %p1135_p6 = scmp.lt.u32.totalorder %s1126_s26, %s1384_s1 }
  0x3a   : > { %p1130_p1 = pneg %p1129_p0  ;;  %p1134_p5 = por %p1133_p3, %p1132_p2 }
  0x3c   : > { %p1136_p8 = por %p1135_p6, %p1134_p5 }
  0x3e   : > { %p1137_p7 = pnand %p1136_p8, %p1130_p1 }
  0x40   : > { %1140 = shalt.err (!%p1137_p7)
}
  0x41   : > { %s1141_s11 = scalar_lea.vmem %s1392_s23, 2048  ;;  %s1230_s12 = smov [#allocation8]  }
  0x42   : > { %p1142_p12 = scmp.ne.s32.totalorder %s1392_s23, %s1141_s11  ;;  %s1146_s13 = sshll.u32 %s1230_s12, 4  ;;  %s1147_s13 = int_to_ptr.vmem [resolvable:$false] %s1146_s13 }
  0x43   : > { %s1148_s17 = scalar_lea.vmem %s1147_s13, 4096  ;;  %p1149_p9 = scmp.lt.s32.totalorder %s1392_s23, %s1147_s13 }
  0x44   : > { %p1144_p0 = pnand %p1142_p12, %p1128_p13  ;;  %p1150_p2 = scmp.lt.s32.totalorder %s1148_s17, %s1141_s11 }
  0x46   : > { %p1145_p10 = pneg %p1144_p0  ;;  %p1151_p3 = por %p1150_p2, %p1149_p9 }
  0x48   : > { %p1152_p5 = pnand %p1151_p3, %p1145_p10 }
  0x4a   : > { %1155 = shalt.err (!%p1152_p5)
}
  0x4b   : > { %s1231_s18 = smov 128   ;;  %s1232_s19 = smov 8  }
  0x4c   : > { %1024 = dma.hbm_to_vmem [thread:$0]  (!%p1388_p11), %s1384_s1, 2048, %s1392_s23, %s1394_s25, %s1231_s18, %s1231_s18, %s1232_s19  }
  0x4d   : > { %p906_p7 = scmp.ge.s32.totalorder %s1224_s8, 1  ;;  %p120_p13 = scmp.lt.s32.totalorder %s1224_s8, 3 }
  0x4f   : > { %p121_p1 = pnand %p906_p7, %p120_p13 }
  0x50   : > { %s1425_s20 = sand.u32 (!%p121_p1), 1, %s1216_s6  }
  0x51   : > { %124 = sbr.rel (%p121_p1) target bundleno = 459 (0x1cb), region = 24  ;;  %s907_s21 = sshll.u32 (!%p121_p1), %s1425_s20, 7 }
  0x52   : > { %s127_s22 = scalar_lea.sflag (!%p121_p1), [#allocation9], %s1425_s20  ;;  %s1431_s26 = scalar_lea.vmem (!%p121_p1), [#allocation8], %s907_s21 }
  0x58   : > { %1203 = dma.done.wait (%p1364_p4), %s127_s22, 2048  }
  0x59   : > { %1205 = vsyncadd (%p1364_p4), %s127_s22, 4294965248  ;;  %s1437_s1 = sld [smem:[#allocation4]]  ;;  %v1233_v0 = vmov 0.0   ;;  %s909_s24 = sld [smem:[#allocation5 + $0x1]]  ;;  %v152_v2 = vld [vmem:[%s1431_s26] sm:$0xff]  ;;  %v910_v4 = vld [vmem:[%s1431_s26 + $0x10] sm:$0xff] }
  0x5a   : > { %s151_s23 = sld [smem:[#allocation5]]  ;;  %222 = vst [vmem:[#allocation2] sm:$0xff] %v1233_v0  ;;  %223 = vst [vmem:[#allocation2 + $0x8] sm:$0xff] %v1233_v0  ;;  %s1439_s25 = sld [smem:[#allocation5 + $0x2]]  ;;  %v913_v7 = vld [vmem:[%s1431_s26 + $0x20] sm:$0xff]  ;;  %v916_v10 = vld [vmem:[%s1431_s26 + $0x30] sm:$0xff] }
  0x5b   : > { %224 = vst [vmem:[#allocation2 + $0x10] sm:$0xff] %v1233_v0  ;;  %s1441_s27 = sld [smem:[#allocation5 + $0x3]]  ;;  %s1443_s14 = sld [smem:[#allocation5 + $0x4]]  ;;  %v153_v14 = vld [vmem:[%s1431_s26 + $0x8] sm:$0xff]  ;;  %v919_v15 = vld [vmem:[%s1431_s26 + $0x40] sm:$0xff]  ;;  %v911_v18 = vld [vmem:[%s1431_s26 + $0x18] sm:$0xff] }
  0x5c   : > { %s1445_s28 = sld [smem:[#allocation5 + $0x5]]  ;;  %s1450_s29 = sld [smem:[#allocation5 + $0x6]]  ;;  %v914_v19 = vld [vmem:[%s1431_s26 + $0x28] sm:$0xff]  ;;  %v917_v23 = vld [vmem:[%s1431_s26 + $0x38] sm:$0xff]  ;;  %v922_v24 = vld [vmem:[%s1431_s26 + $0x50] sm:$0xff]  ;;  %vm225_vm0 = vcmask 130048  }
  0x5d   : > { %s1456_s30 = sld [smem:[#allocation5 + $0x7]]  ;;  %v920_v30 = vld [vmem:[%s1431_s26 + $0x48] sm:$0xff]  ;;  %v925_v31 = vld [vmem:[%s1431_s26 + $0x60] sm:$0xff]  ;;  %v923_v37 = vld [vmem:[%s1431_s26 + $0x58] sm:$0xff]  ;;  %s1234_s9 = smov 2  }
  0x5e   : > { %v928_v38 = vld [vmem:[%s1431_s26 + $0x70] sm:$0xff]  ;;  %v926_v44 = vld [vmem:[%s1431_s26 + $0x68] sm:$0xff]  ;;  %v929_v49 = vld [vmem:[%s1431_s26 + $0x78] sm:$0xff]  ;;  %s1235_s11 = smov 3   ;;  %s1236_s12 = smov 1  }
  0x5f   : > { %v150_v1 = vstv %s1437_s1  ;;  %v163_v6 = vstv %s909_s24  ;;  %s1237_s13 = smov 127   ;;  %s1238_s17 = smov 126  }
  0x60   : > { %v154_v3 = vstv %s151_s23  ;;  %v172_v8 = vstv %s1439_s25  ;;  %v164_v9 = vmul.f32 %v910_v4, %v163_v6  ;;  %v165_v22 = vmul.f32 %v911_v18, %v163_v6  ;;  %s1239_s18 = smov 125   ;;  %s236_s19 = sld [smem:[#allocation6]] }
  0x61   : > { %v155_v5 = vmul.f32 %v154_v3, %v152_v2  ;;  %v181_v11 = vstv %s1441_s27  ;;  %v173_v13 = vmul.f32 %v913_v7, %v172_v8  ;;  %v190_v16 = vstv %s1443_s14  ;;  %s931_s22 = sld [smem:[#allocation6 + $0x1]]  ;;  %s1608_s23 = sld [smem:[#allocation6 + $0x3]] }
  0x62   : > { %v156_v17 = vmul.f32 %v154_v3, %v153_v14  ;;  %v182_v21 = vmul.f32 %v916_v10, %v181_v11  ;;  %v199_v25 = vstv %s1445_s28  ;;  %v174_v27 = vmul.f32 %v914_v19, %v172_v8  ;;  %s930_s1 = sld [smem:[#allocation4 + $0x1]]  ;;  %s932_s24 = sld [smem:[#allocation6 + $0x2]] }
  0x63   : > { %v157_v12 = vadd.f32 %v155_v5, %v150_v1  ;;  %v191_v29 = vmul.f32 %v919_v15, %v190_v16  ;;  %v208_v32 = vstv %s1450_s29  ;;  %v183_v34 = vmul.f32 %v917_v23, %v181_v11  ;;  %s1618_s25 = sld [smem:[#allocation6 + $0x4]]  ;;  %s935_s27 = sld [smem:[#allocation6 + $0x5]] }
  0x64   : > { %v158_v26 = vadd.f32 %v156_v17, %v150_v1  ;;  %v200_v36 = vmul.f32 %v922_v24, %v199_v25  ;;  %v217_v39 = vstv %s1456_s30  ;;  %v192_v41 = vmul.f32 %v920_v30, %v190_v16  ;;  %s936_s14 = sld [smem:[#allocation6 + $0x6]]  ;;  %s937_s28 = sld [smem:[#allocation6 + $0x80]] }
  0x65   : > { %v166_v20 = vadd.f32 %v164_v9, %v157_v12  ;;  %v209_v43 = vmul.f32 %v925_v31, %v208_v32  ;;  %v201_v46 = vmul.f32 %v923_v37, %v199_v25  ;;  %v218_v48 = vmul.f32 %v928_v38, %v217_v39  ;;  %s1644_s29 = sld [smem:[#allocation6 + $0x81]]  ;;  %s1646_s30 = sld [smem:[#allocation6 + $0x83]] }
  0x66   : > { %v167_v33 = vadd.f32 %v165_v22, %v158_v26  ;;  %v210_v51 = vmul.f32 %v926_v44, %v208_v32  ;;  %v219_v54 = vmul.f32 %v929_v49, %v217_v39  ;;  %v237_v4 = vstv %s236_s19  ;;  %s1652_s19 = sld [smem:[#allocation6 + $0x82]]  ;;  %p1874_p9 = scmp.ne.s32.totalorder %s1871_s15, 0 }
  0x67   : > { %v175_v28 = vadd.f32 %v173_v13, %v166_v20  ;;  %v247_v5 = vstv %s931_s22  ;;  %v263_v18 = vstv %s1608_s23  ;;  %s942_s22 = sld [smem:[#allocation6 + $0x85]]  ;;  %s944_s23 = sld [smem:[#allocation6 + $0x100]] }
  0x68   : > { %v176_v40 = vadd.f32 %v174_v27, %v167_v33  ;;  %v229_v7 = vstv %s930_s1  ;;  %v257_v19 = vstv %s932_s24  ;;  %s943_s1 = sld [smem:[#allocation6 + $0x86]]  ;;  %s1685_s24 = sld [smem:[#allocation6 + $0x103]] }
  0x69   : > { %v184_v35 = vadd.f32 %v182_v21, %v175_v28 }
  0x6a   : > { %v185_v45 = vadd.f32 %v183_v34, %v176_v40 }
  0x6b   : > { %v193_v42 = vadd.f32 %v191_v29, %v184_v35  ;;  %v273_v29 = vstv %s1618_s25  ;;  %s951_s25 = sld [smem:[#allocation6 + $0x180]] }
  0x6c   : > { %v194_v50 = vadd.f32 %v192_v41, %v185_v45  ;;  %v293_v45 = vstv %s936_s14  ;;  %s1702_s14 = sld [smem:[#allocation6 + $0x183]] }
  0x6d   : > { %v202_v47 = vadd.f32 %v200_v36, %v193_v42  ;;  %v283_v42 = vstv %s935_s27  ;;  %s952_s27 = sld [smem:[#allocation6 + $0x181]] }
  0x6e   : > { %v203_v53 = vadd.f32 %v201_v46, %v194_v50 }
  0x6f   : > { %v211_v52 = vadd.f32 %v209_v43, %v202_v47 }
  0x70   : > { %v212_v56 = vadd.f32 %v210_v51, %v203_v53  ;;  %v315_v53 = vstv %s1644_s29  ;;  %s955_s29 = sld [smem:[#allocation6 + $0x184]] }
  0x71   : > { %v220_v55 = vadd.f32 %v218_v48, %v211_v52  ;;  %v305_v48 = vstv %s937_s28  ;;  %s1704_s28 = sld [smem:[#allocation6 + $0x182]] }
  0x72   : > { %v221_v57 = vadd.f32 %v219_v54, %v212_v56 }
  0x73   : > { %226 = vst.msk [vmem:[#allocation2 + $0x3] sm:$0xff] %vm225_vm0, %v220_v55 }
  0x74   : > { %227 = vst.msk [vmem:[#allocation2 + $0xb] sm:$0xff] %vm225_vm0, %v221_v57 }
  0x7a   : > { %v1476_v58 = vld [vmem:[#allocation2] sm:$0xff] }
  0x7b   : > { %242 = vrot.lane.b32.xlu1 %v1476_v58, %s1234_s9  ;;  %232 = vrot.lane.b32.xlu0 %v1476_v58, %s1235_s11  ;;  %v1482_v59 = vld [vmem:[#allocation2 + $0x8] sm:$0xff]  ;;  %v264_v24 = vmul.f32 %v263_v18, %v1476_v58 }
  0x7c   : > { %v1504_v60 = vld [vmem:[#allocation2 + $0x9] sm:$0xff]  ;;  %v1506_v61 = vld [vmem:[#allocation2 + $0x1] sm:$0xff]  ;;  %v265_v26 = vmul.f32 %v263_v18, %v1482_v59 }
  0x7d   : > { %v1532_v62 = vld [vmem:[#allocation2 + $0xa] sm:$0xff]  ;;  %v1534_v63 = vld [vmem:[#allocation2 + $0x2] sm:$0xff] }
  0x7e   : > { %v1560_v0 = vld [vmem:[#allocation2 + $0xb] sm:$0xff]  ;;  %v1562_v1 = vld [vmem:[#allocation2 + $0x3] sm:$0xff] }
  0x7f   : > { %244 = vrot.lane.b32.xlu1 %v1482_v59, %s1234_s9  ;;  %234 = vrot.lane.b32.xlu0 %v1482_v59, %s1235_s11  ;;  %v1588_v2 = vld [vmem:[#allocation2 + $0xc] sm:$0xff]  ;;  %v1590_v3 = vld [vmem:[#allocation2 + $0x4] sm:$0xff] }
  0x80   : > { %v1620_v12 = vld [vmem:[#allocation2 + $0xd] sm:$0xff]  ;;  %v1622_v13 = vld [vmem:[#allocation2 + $0x5] sm:$0xff] }
  0x83   : > { %254 = vrot.lane.b32.xlu1 %v1482_v59, %s1236_s12  ;;  %252 = vrot.lane.b32.xlu0 %v1476_v58, %s1236_s12 }
  0x87   : > { %270 = vrot.lane.b32.xlu1 %v1482_v59, %s1237_s13  ;;  %268 = vrot.lane.b32.xlu0 %v1476_v58, %s1237_s13 }
  0x8b   : > { %280 = vrot.lane.b32.xlu1 %v1482_v59, %s1238_s17  ;;  %278 = vrot.lane.b32.xlu0 %v1476_v58, %s1238_s17 }
  0x8f   : > { %290 = vrot.lane.b32.xlu1 %v1482_v59, %s1239_s18  ;;  %288 = vrot.lane.b32.xlu0 %v1476_v58, %s1239_s18  ;;  %v1659_v58 = vld [vmem:[#allocation2 + $0xe] sm:$0xff]  ;;  %v1661_v59 = vld [vmem:[#allocation2 + $0x6] sm:$0xff] }
  0x93   : > { %302 = vrot.lane.b32.xlu1 %v1504_v60, %s1235_s11  ;;  %300 = vrot.lane.b32.xlu0 %v1506_v61, %s1235_s11 }
  0x97   : > { %312 = vrot.lane.b32.xlu1 %v1504_v60, %s1234_s9  ;;  %310 = vrot.lane.b32.xlu0 %v1506_v61, %s1234_s9 }
  0x9b   : > { %322 = vrot.lane.b32.xlu1 %v1504_v60, %s1236_s12  ;;  %320 = vrot.lane.b32.xlu0 %v1506_v61, %s1236_s12 }
  0x9f   : > { %338 = vrot.lane.b32.xlu1 %v1504_v60, %s1237_s13  ;;  %336 = vrot.lane.b32.xlu0 %v1506_v61, %s1237_s13 }
  0xa3   : > { %348 = vrot.lane.b32.xlu1 %v1504_v60, %s1238_s17  ;;  %346 = vrot.lane.b32.xlu0 %v1506_v61, %s1238_s17 }
  0xa7   : > { %358 = vrot.lane.b32.xlu1 %v1504_v60, %s1239_s18  ;;  %356 = vrot.lane.b32.xlu0 %v1506_v61, %s1239_s18 }
  0xab   : > { %370 = vrot.lane.b32.xlu1 %v1532_v62, %s1235_s11  ;;  %368 = vrot.lane.b32.xlu0 %v1534_v63, %s1235_s11 }
  0xaf   : > { %380 = vrot.lane.b32.xlu1 %v1532_v62, %s1234_s9  ;;  %378 = vrot.lane.b32.xlu0 %v1534_v63, %s1234_s9 }
  0xb3   : > { %390 = vrot.lane.b32.xlu1 %v1532_v62, %s1236_s12  ;;  %388 = vrot.lane.b32.xlu0 %v1534_v63, %s1236_s12 }
  0xb7   : > { %406 = vrot.lane.b32.xlu1 %v1532_v62, %s1237_s13  ;;  %404 = vrot.lane.b32.xlu0 %v1534_v63, %s1237_s13 }
  0xbb   : > { %416 = vrot.lane.b32.xlu1 %v1532_v62, %s1238_s17  ;;  %414 = vrot.lane.b32.xlu0 %v1534_v63, %s1238_s17 }
  0xbf   : > { %426 = vrot.lane.b32.xlu1 %v1532_v62, %s1239_s18  ;;  %424 = vrot.lane.b32.xlu0 %v1534_v63, %s1239_s18 }
  0xc3   : > { %438 = vrot.lane.b32.xlu1 %v1560_v0, %s1235_s11  ;;  %436 = vrot.lane.b32.xlu0 %v1562_v1, %s1235_s11 }
  0xc7   : > { %448 = vrot.lane.b32.xlu1 %v1560_v0, %s1234_s9  ;;  %446 = vrot.lane.b32.xlu0 %v1562_v1, %s1234_s9 }
  0xcb   : > { %458 = vrot.lane.b32.xlu1 %v1560_v0, %s1236_s12  ;;  %456 = vrot.lane.b32.xlu0 %v1562_v1, %s1236_s12 }
  0xcf   : > { %474 = vrot.lane.b32.xlu1 %v1560_v0, %s1237_s13  ;;  %472 = vrot.lane.b32.xlu0 %v1562_v1, %s1237_s13 }
  0xd3   : > { %484 = vrot.lane.b32.xlu1 %v1560_v0, %s1238_s17  ;;  %482 = vrot.lane.b32.xlu0 %v1562_v1, %s1238_s17 }
  0xd7   : > { %494 = vrot.lane.b32.xlu1 %v1560_v0, %s1239_s18  ;;  %492 = vrot.lane.b32.xlu0 %v1562_v1, %s1239_s18 }
  0xdb   : > { %506 = vrot.lane.b32.xlu1 %v1588_v2, %s1235_s11  ;;  %504 = vrot.lane.b32.xlu0 %v1590_v3, %s1235_s11 }
  0xdf   : > { %516 = vrot.lane.b32.xlu1 %v1588_v2, %s1234_s9  ;;  %514 = vrot.lane.b32.xlu0 %v1590_v3, %s1234_s9 }
  0xe3   : > { %526 = vrot.lane.b32.xlu1 %v1588_v2, %s1236_s12  ;;  %524 = vrot.lane.b32.xlu0 %v1590_v3, %s1236_s12 }
  0xe7   : > { %542 = vrot.lane.b32.xlu1 %v1588_v2, %s1237_s13  ;;  %540 = vrot.lane.b32.xlu0 %v1590_v3, %s1237_s13 }
  0xeb   : > { %552 = vrot.lane.b32.xlu1 %v1588_v2, %s1238_s17  ;;  %550 = vrot.lane.b32.xlu0 %v1590_v3, %s1238_s17 }
  0xed   : > { %v243_v6 = vpop.permute.xlu1 %242  ;;  %v233_v8 = vpop.permute.xlu0 %232 }
  0xee   : > { %v238_v9 = vmul.f32 %v237_v4, %v233_v8  ;;  %v248_v10 = vmul.f32 %v247_v5, %v243_v6  ;;  %v331_v6 = vstv %s1646_s30  ;;  %s956_s30 = sld [smem:[#allocation6 + $0x185]] }
  0xef   : > { %562 = vrot.lane.b32.xlu1 %v1588_v2, %s1239_s18  ;;  %560 = vrot.lane.b32.xlu0 %v1590_v3, %s1239_s18  ;;  %v332_v18 = vmul.f32 %v331_v6, %v1506_v61 }
  0xf0   : > { %v240_v11 = vadd.f32 %v238_v9, %v229_v7 }
  0xf1   : > { %v245_v14 = vpop.permute.xlu1 %244  ;;  %v235_v15 = vpop.permute.xlu0 %234 }
  0xf2   : > { %v250_v16 = vadd.f32 %v248_v10, %v240_v11  ;;  %v239_v17 = vmul.f32 %v237_v4, %v235_v15  ;;  %v249_v20 = vmul.f32 %v247_v5, %v245_v14  ;;  %v325_v11 = vstv %s1652_s19  ;;  %s957_s19 = sld [smem:[#allocation6 + $0x186]] }
  0xf3   : > { %574 = vrot.lane.b32.xlu1 %v1620_v12, %s1235_s11  ;;  %572 = vrot.lane.b32.xlu0 %v1622_v13, %s1235_s11 }
  0xf4   : > { %v241_v21 = vadd.f32 %v239_v17, %v229_v7 }
  0xf5   : > { %v255_v22 = vpop.permute.xlu1 %254  ;;  %v253_v23 = vpop.permute.xlu0 %252 }
  0xf6   : > { %v251_v25 = vadd.f32 %v249_v20, %v241_v21  ;;  %v259_v27 = vmul.f32 %v257_v19, %v255_v22  ;;  %v258_v28 = vmul.f32 %v257_v19, %v253_v23 }
  0xf7   : > { %584 = vrot.lane.b32.xlu1 %v1620_v12, %s1234_s9  ;;  %582 = vrot.lane.b32.xlu0 %v1622_v13, %s1234_s9 }
  0xf8   : > { %v261_v30 = vadd.f32 %v259_v27, %v251_v25  ;;  %v260_v31 = vadd.f32 %v258_v28, %v250_v16  ;;  %v333_v16 = vmul.f32 %v331_v6, %v1504_v60 }
  0xf9   : > { %v271_v32 = vpop.permute.xlu1 %270  ;;  %v269_v33 = vpop.permute.xlu0 %268 }
  0xfa   : > { %v267_v34 = vadd.f32 %v265_v26, %v261_v30  ;;  %v266_v35 = vadd.f32 %v264_v24, %v260_v31  ;;  %v275_v36 = vmul.f32 %v273_v29, %v271_v32  ;;  %v274_v37 = vmul.f32 %v273_v29, %v269_v33 }
  0xfb   : > { %594 = vrot.lane.b32.xlu1 %v1620_v12, %s1236_s12  ;;  %592 = vrot.lane.b32.xlu0 %v1622_v13, %s1236_s12  ;;  %v351_v31 = vstv %s942_s22  ;;  %s959_s22 = sld [smem:[#allocation6 + $0x201]] }
  0xfc   : > { %v277_v38 = vadd.f32 %v275_v36, %v267_v34  ;;  %v276_v39 = vadd.f32 %v274_v37, %v266_v35  ;;  %v361_v36 = vstv %s943_s1  ;;  %s1710_s1 = sld [smem:[#allocation6 + $0x203]] }
  0xfd   : > { %v281_v40 = vpop.permute.xlu1 %280  ;;  %v279_v41 = vpop.permute.xlu0 %278 }
  0xfe   : > { %v285_v46 = vmul.f32 %v283_v42, %v281_v40  ;;  %v284_v47 = vmul.f32 %v283_v42, %v279_v41 }
  0xff   : > { %610 = vrot.lane.b32.xlu1 %v1620_v12, %s1237_s13  ;;  %608 = vrot.lane.b32.xlu0 %v1622_v13, %s1237_s13 }
 0x100   : > { %v287_v54 = vadd.f32 %v285_v46, %v277_v38  ;;  %v286_v55 = vadd.f32 %v284_v47, %v276_v39  ;;  %v373_v39 = vstv %s944_s23  ;;  %s1712_s23 = sld [smem:[#allocation6 + $0x202]] }
 0x101   : > { %v291_v43 = vpop.permute.xlu1 %290  ;;  %v289_v44 = vpop.permute.xlu0 %288 }
 0x102   : > { %v295_v51 = vmul.f32 %v293_v45, %v291_v43  ;;  %v294_v52 = vmul.f32 %v293_v45, %v289_v44 }
 0x103   : > { %620 = vrot.lane.b32.xlu1 %v1620_v12, %s1238_s17  ;;  %618 = vrot.lane.b32.xlu0 %v1622_v13, %s1238_s17 }
 0x104   : > { %v297_v7 = vadd.f32 %v295_v51, %v287_v54  ;;  %v296_v8 = vadd.f32 %v294_v52, %v286_v55 }
 0x105   : > { %v303_v49 = vpop.permute.xlu1 %302  ;;  %v301_v50 = vpop.permute.xlu0 %300 }
 0x106   : > { %v307_v56 = vmul.f32 %v305_v48, %v303_v49  ;;  %v306_v57 = vmul.f32 %v305_v48, %v301_v50 }
 0x107   : > { %630 = vrot.lane.b32.xlu1 %v1620_v12, %s1239_s18  ;;  %628 = vrot.lane.b32.xlu0 %v1622_v13, %s1239_s18 }
 0x108   : > { %v309_v14 = vadd.f32 %v307_v56, %v297_v7  ;;  %v308_v15 = vadd.f32 %v306_v57, %v296_v8 }
 0x109   : > { %v313_v4 = vpop.permute.xlu1 %312  ;;  %v311_v5 = vpop.permute.xlu0 %310 }
 0x10a   : > { %v317_v9 = vmul.f32 %v315_v53, %v313_v4  ;;  %v316_v10 = vmul.f32 %v315_v53, %v311_v5  ;;  %v399_v53 = vstv %s1685_s24  ;;  %s963_s24 = sld [smem:[#allocation6 + $0x205]] }
 0x10b   : > { %642 = vrot.lane.b32.xlu1 %v1659_v58, %s1235_s11  ;;  %640 = vrot.lane.b32.xlu0 %v1661_v59, %s1235_s11  ;;  %s941_s11 = sld [smem:[#allocation6 + $0x84]] }
 0x10c   : > { %v319_v20 = vadd.f32 %v317_v9, %v309_v14  ;;  %v318_v21 = vadd.f32 %v316_v10, %v308_v15  ;;  %v401_v9 = vmul.f32 %v399_v53, %v1532_v62  ;;  %v400_v10 = vmul.f32 %v399_v53, %v1534_v63 }
 0x10d   : > { %v323_v17 = vpop.permute.xlu1 %322  ;;  %v321_v19 = vpop.permute.xlu0 %320 }
 0x10e   : > { %v327_v22 = vmul.f32 %v325_v11, %v323_v17  ;;  %v326_v23 = vmul.f32 %v325_v11, %v321_v19 }
 0x10f   : > { %652 = vrot.lane.b32.xlu1 %v1659_v58, %s1234_s9  ;;  %650 = vrot.lane.b32.xlu0 %v1661_v59, %s1234_s9  ;;  %s1683_s9 = sld [smem:[#allocation6 + $0x101]] }
 0x110   : > { %v329_v24 = vadd.f32 %v327_v22, %v319_v20  ;;  %v328_v25 = vadd.f32 %v326_v23, %v318_v21 }
 0x111   : > { %v339_v26 = vpop.permute.xlu1 %338  ;;  %v337_v27 = vpop.permute.xlu0 %336  ;;  %v341_v30 = vstv %s941_s11  ;;  %s958_s11 = sld [smem:[#allocation6 + $0x200]] }
 0x112   : > { %v335_v60 = vadd.f32 %v333_v16, %v329_v24  ;;  %v334_v28 = vadd.f32 %v332_v18, %v328_v25  ;;  %v343_v34 = vmul.f32 %v341_v30, %v339_v26  ;;  %v342_v35 = vmul.f32 %v341_v30, %v337_v27 }
 0x113   : > { %662 = vrot.lane.b32.xlu1 %v1659_v58, %s1236_s12  ;;  %660 = vrot.lane.b32.xlu0 %v1661_v59, %s1236_s12  ;;  %s1691_s12 = sld [smem:[#allocation6 + $0x102]]  ;;  %v441_v30 = vstv %s951_s25 }
 0x114   : > { %v345_v42 = vadd.f32 %v343_v34, %v335_v60  ;;  %v344_v43 = vadd.f32 %v342_v35, %v334_v28  ;;  %s1720_s25 = sld [smem:[#allocation6 + $0x282]] }
 0x115   : > { %v349_v61 = vpop.permute.xlu1 %348  ;;  %v347_v29 = vpop.permute.xlu0 %346  ;;  %v383_v46 = vstv %s1683_s9  ;;  %s962_s9 = sld [smem:[#allocation6 + $0x204]] }
 0x116   : > { %v353_v37 = vmul.f32 %v351_v31, %v349_v61  ;;  %v352_v38 = vmul.f32 %v351_v31, %v347_v29 }
 0x117   : > { %678 = vrot.lane.b32.xlu1 %v1659_v58, %s1237_s13  ;;  %676 = vrot.lane.b32.xlu0 %v1661_v59, %s1237_s13  ;;  %s948_s13 = sld [smem:[#allocation6 + $0x104]] }
 0x118   : > { %v355_v47 = vadd.f32 %v353_v37, %v345_v42  ;;  %v354_v48 = vadd.f32 %v352_v38, %v344_v43  ;;  %v451_v37 = vstv %s952_s27  ;;  %s969_s27 = sld [smem:[#allocation6 + $0x284]] }
 0x119   : > { %v359_v32 = vpop.permute.xlu1 %358  ;;  %v357_v33 = vpop.permute.xlu0 %356  ;;  %v393_v4 = vstv %s1691_s12  ;;  %s964_s12 = sld [smem:[#allocation6 + $0x206]] }
 0x11a   : > { %v363_v44 = vmul.f32 %v361_v36, %v359_v32  ;;  %v362_v45 = vmul.f32 %v361_v36, %v357_v33 }
 0x11b   : > { %688 = vrot.lane.b32.xlu1 %v1659_v58, %s1238_s17  ;;  %686 = vrot.lane.b32.xlu0 %v1661_v59, %s1238_s17  ;;  %s949_s17 = sld [smem:[#allocation6 + $0x105]] }
 0x11c   : > { %v365_v54 = vadd.f32 %v363_v44, %v355_v47  ;;  %v364_v55 = vadd.f32 %v362_v45, %v354_v48  ;;  %v467_v44 = vstv %s1702_s14  ;;  %s970_s14 = sld [smem:[#allocation6 + $0x285]] }
 0x11d   : > { %v371_v40 = vpop.permute.xlu1 %370  ;;  %v369_v41 = vpop.permute.xlu0 %368  ;;  %v409_v25 = vstv %s948_s13  ;;  %s965_s13 = sld [smem:[#allocation6 + $0x280]] }
 0x11e   : > { %v375_v49 = vmul.f32 %v373_v39, %v371_v40  ;;  %v374_v50 = vmul.f32 %v373_v39, %v369_v41 }
 0x11f   : > { %698 = vrot.lane.b32.xlu1 %v1659_v58, %s1239_s18  ;;  %696 = vrot.lane.b32.xlu0 %v1661_v59, %s1239_s18  ;;  %s950_s18 = sld [smem:[#allocation6 + $0x106]] }
 0x120   : > { %v377_v5 = vadd.f32 %v375_v49, %v365_v54  ;;  %v376_v6 = vadd.f32 %v374_v50, %v364_v55  ;;  %v461_v49 = vstv %s1704_s28  ;;  %v469_v54 = vmul.f32 %v467_v44, %v1560_v0  ;;  %s971_s28 = sld [smem:[#allocation6 + $0x286]] }
 0x121   : > { %v381_v51 = vpop.permute.xlu1 %380  ;;  %v379_v52 = vpop.permute.xlu0 %378  ;;  %v419_v62 = vstv %s949_s17  ;;  %v468_v55 = vmul.f32 %v467_v44, %v1562_v1  ;;  %v487_v0 = vstv %s956_s30  ;;  %s966_s17 = sld [smem:[#allocation6 + $0x281]] }
 0x122   : > { %v385_v56 = vmul.f32 %v383_v46, %v381_v51  ;;  %v384_v57 = vmul.f32 %v383_v46, %v379_v52  ;;  %s973_s30 = sld [smem:[#allocation6 + $0x301]] }
 0x124   : > { %v387_v11 = vadd.f32 %v385_v56, %v377_v5  ;;  %v386_v14 = vadd.f32 %v384_v57, %v376_v6 }
 0x125   : > { %v391_v7 = vpop.permute.xlu1 %390  ;;  %v389_v8 = vpop.permute.xlu0 %388  ;;  %v429_v28 = vstv %s950_s18  ;;  %s1718_s18 = sld [smem:[#allocation6 + $0x283]] }
 0x126   : > { %v395_v15 = vmul.f32 %v393_v4, %v391_v7  ;;  %v394_v16 = vmul.f32 %v393_v4, %v389_v8 }
 0x128   : > { %v397_v17 = vadd.f32 %v395_v15, %v387_v11  ;;  %v396_v18 = vadd.f32 %v394_v16, %v386_v14  ;;  %v477_v16 = vstv %s955_s29  ;;  %s972_s29 = sld [smem:[#allocation6 + $0x300]] }
 0x129   : > { %v407_v19 = vpop.permute.xlu1 %406  ;;  %v405_v20 = vpop.permute.xlu0 %404 }
 0x12a   : > { %v403_v21 = vadd.f32 %v401_v9, %v397_v17  ;;  %v402_v22 = vadd.f32 %v400_v10, %v396_v18  ;;  %v411_v27 = vmul.f32 %v409_v25, %v407_v19  ;;  %v410_v60 = vmul.f32 %v409_v25, %v405_v20 }
 0x12b   : > { %v497_v20 = vstv %s957_s19  ;;  %s1726_s19 = sld [smem:[#allocation6 + $0x303]] }
 0x12c   : > { %v413_v33 = vadd.f32 %v411_v27, %v403_v21  ;;  %v412_v34 = vadd.f32 %v410_v60, %v402_v22  ;;  %v519_v60 = vstv %s959_s22  ;;  %s976_s22 = sld [smem:[#allocation6 + $0x304]] }
 0x12d   : > { %v417_v23 = vpop.permute.xlu1 %416  ;;  %v415_v24 = vpop.permute.xlu0 %414 }
 0x12e   : > { %v421_v61 = vmul.f32 %v419_v62, %v417_v23  ;;  %v420_v29 = vmul.f32 %v419_v62, %v415_v24  ;;  %v509_v23 = vstv %s958_s11  ;;  %s1728_s11 = sld [smem:[#allocation6 + $0x302]] }
 0x130   : > { %v423_v38 = vadd.f32 %v421_v61, %v413_v33  ;;  %v422_v39 = vadd.f32 %v420_v29, %v412_v34  ;;  %v535_v33 = vstv %s1710_s1  ;;  %s977_s1 = sld [smem:[#allocation6 + $0x305]] }
 0x131   : > { %v427_v63 = vpop.permute.xlu1 %426  ;;  %v425_v26 = vpop.permute.xlu0 %424  ;;  %v536_v44 = vmul.f32 %v535_v33, %v1590_v3 }
 0x132   : > { %v431_v35 = vmul.f32 %v429_v28, %v427_v63  ;;  %v430_v36 = vmul.f32 %v429_v28, %v425_v26 }
 0x134   : > { %v433_v45 = vadd.f32 %v431_v35, %v423_v38  ;;  %v432_v46 = vadd.f32 %v430_v36, %v422_v39  ;;  %v529_v38 = vstv %s1712_s23  ;;  %s978_s23 = sld [smem:[#allocation6 + $0x306]] }
 0x135   : > { %v439_v31 = vpop.permute.xlu1 %438  ;;  %v437_v32 = vpop.permute.xlu0 %436 }
 0x136   : > { %v443_v40 = vmul.f32 %v441_v30, %v439_v31  ;;  %v442_v41 = vmul.f32 %v441_v30, %v437_v32 }
 0x138   : > { %v445_v50 = vadd.f32 %v443_v40, %v433_v45  ;;  %v444_v51 = vadd.f32 %v442_v41, %v432_v46 }
 0x139   : > { %v449_v42 = vpop.permute.xlu1 %448  ;;  %v447_v43 = vpop.permute.xlu0 %446 }
 0x13a   : > { %v453_v47 = vmul.f32 %v451_v37, %v449_v42  ;;  %v452_v48 = vmul.f32 %v451_v37, %v447_v43  ;;  %v537_v43 = vmul.f32 %v535_v33, %v1588_v2  ;;  %v555_v2 = vstv %s963_s24 }
 0x13c   : > { %v455_v56 = vadd.f32 %v453_v47, %v445_v50  ;;  %v454_v57 = vadd.f32 %v452_v48, %v444_v51 }
 0x13d   : > { %v459_v52 = vpop.permute.xlu1 %458  ;;  %v457_v53 = vpop.permute.xlu0 %456 }
 0x13e   : > { %v463_v4 = vmul.f32 %v461_v49, %v459_v52  ;;  %v462_v5 = vmul.f32 %v461_v49, %v457_v53 }
 0x140   : > { %v465_v6 = vadd.f32 %v463_v4, %v455_v56  ;;  %v464_v7 = vadd.f32 %v462_v5, %v454_v57  ;;  %v545_v57 = vstv %s962_s9  ;;  %s981_s9 = sshll.u32 %s1342_s3, 7 }
 0x141   : > { %v475_v8 = vpop.permute.xlu1 %474  ;;  %v473_v9 = vpop.permute.xlu0 %472  ;;  %s733_s24 = sadd.s32 1, %s981_s9 }
 0x142   : > { %v471_v10 = vadd.f32 %v469_v54, %v465_v6  ;;  %v470_v11 = vadd.f32 %v468_v55, %v464_v7  ;;  %v479_v18 = vmul.f32 %v477_v16, %v475_v8  ;;  %v478_v19 = vmul.f32 %v477_v16, %v473_v9 }
 0x143   : > { %v565_v7 = vstv %s964_s12  ;;  %s1735_s12 = sld [smem:[#allocation7 + %s981_s9]] }
 0x144   : > { %v481_v62 = vadd.f32 %v479_v18, %v471_v10  ;;  %v480_v63 = vadd.f32 %v478_v19, %v470_v11  ;;  %v577_v10 = vstv %s965_s13  ;;  %s745_s13 = sadd.s32 2, %s981_s9 }
 0x145   : > { %v485_v14 = vpop.permute.xlu1 %484  ;;  %v483_v15 = vpop.permute.xlu0 %482 }
 0x146   : > { %v489_v21 = vmul.f32 %v487_v0, %v485_v14  ;;  %v488_v22 = vmul.f32 %v487_v0, %v483_v15 }
 0x148   : > { %v491_v28 = vadd.f32 %v489_v21, %v481_v62  ;;  %v490_v61 = vadd.f32 %v488_v22, %v480_v63 }
 0x149   : > { %v495_v1 = vpop.permute.xlu1 %494  ;;  %v493_v17 = vpop.permute.xlu0 %492 }
 0x14a   : > { %v499_v26 = vmul.f32 %v497_v20, %v495_v1  ;;  %v498_v27 = vmul.f32 %v497_v20, %v493_v17  ;;  %v587_v17 = vstv %s966_s17  ;;  %s1737_s17 = sld [smem:[#allocation7 + %s733_s24]] }
 0x14c   : > { %v501_v34 = vadd.f32 %v499_v26, %v491_v28  ;;  %v500_v35 = vadd.f32 %v498_v27, %v490_v61  ;;  %v597_v27 = vstv %s1720_s25  ;;  %s769_s25 = sadd.s32 4, %s981_s9 }
 0x14d   : > { %v507_v24 = vpop.permute.xlu1 %506  ;;  %v505_v25 = vpop.permute.xlu0 %504 }
 0x14e   : > { %v511_v29 = vmul.f32 %v509_v23, %v507_v24  ;;  %v510_v30 = vmul.f32 %v509_v23, %v505_v25  ;;  %v603_v24 = vstv %s1718_s18  ;;  %s757_s18 = sadd.s32 3, %s981_s9 }
 0x150   : > { %v513_v39 = vadd.f32 %v511_v29, %v501_v34  ;;  %v512_v40 = vadd.f32 %v510_v30, %v500_v35  ;;  %v605_v30 = vmul.f32 %v603_v24, %v1620_v12  ;;  %v623_v12 = vstv %s970_s14  ;;  %s793_s14 = sadd.s32 6, %s981_s9 }
 0x151   : > { %v517_v31 = vpop.permute.xlu1 %516  ;;  %v515_v32 = vpop.permute.xlu0 %514 }
 0x152   : > { %v521_v36 = vmul.f32 %v519_v60, %v517_v31  ;;  %v520_v37 = vmul.f32 %v519_v60, %v515_v32  ;;  %v604_v31 = vmul.f32 %v603_v24, %v1622_v13 }
 0x154   : > { %v523_v45 = vadd.f32 %v521_v36, %v513_v39  ;;  %v522_v46 = vadd.f32 %v520_v37, %v512_v40 }
 0x155   : > { %v527_v41 = vpop.permute.xlu1 %526  ;;  %v525_v42 = vpop.permute.xlu0 %524 }
 0x156   : > { %v531_v47 = vmul.f32 %v529_v38, %v527_v41  ;;  %v530_v48 = vmul.f32 %v529_v38, %v525_v42 }
 0x158   : > { %v533_v49 = vadd.f32 %v531_v47, %v523_v45  ;;  %v532_v50 = vadd.f32 %v530_v48, %v522_v46  ;;  %v633_v48 = vstv %s971_s28  ;;  %s805_s28 = sadd.s32 7, %s981_s9 }
 0x159   : > { %v543_v51 = vpop.permute.xlu1 %542  ;;  %v541_v52 = vpop.permute.xlu0 %540 }
 0x15a   : > { %v539_v53 = vadd.f32 %v537_v43, %v533_v49  ;;  %v538_v54 = vadd.f32 %v536_v44, %v532_v50  ;;  %v547_v5 = vmul.f32 %v545_v57, %v543_v51  ;;  %v546_v6 = vmul.f32 %v545_v57, %v541_v52 }
 0x15b   : > { %v613_v44 = vstv %s969_s27  ;;  %v645_v51 = vstv %s972_s29  ;;  %s781_s27 = sadd.s32 5, %s981_s9  ;;  %s1739_s29 = sld [smem:[#allocation7 + %s745_s13]] }
 0x15c   : > { %v549_v15 = vadd.f32 %v547_v5, %v539_v53  ;;  %v548_v16 = vadd.f32 %v546_v6, %v538_v54  ;;  %s1778_s9 = scalar_lea.vmem [#allocation11], %s907_s21 }
 0x15d   : > { %v553_v55 = vpop.permute.xlu1 %552  ;;  %v551_v56 = vpop.permute.xlu0 %550  ;;  %s827_s24 = sshll.u32 %s1778_s9, 4  ;;  %s1802_s24 = int_to_ptr.vmem [resolvable:$true] %s827_s24 }
 0x15e   : > { %v557_v8 = vmul.f32 %v555_v2, %v553_v55  ;;  %v556_v9 = vmul.f32 %v555_v2, %v551_v56  ;;  %v655_v2 = vstv %s973_s30  ;;  %s1741_s30 = sld [smem:[#allocation7 + %s757_s18]]  ;;  %s1156_s13 = scalar_lea.vmem %s1802_s24, 2048 }
 0x15f   : > { %p1157_p4 = scmp.ne.s32.totalorder %s1802_s24, %s1156_s13 }
 0x160   : > { %v559_v18 = vadd.f32 %v557_v8, %v549_v15  ;;  %v558_v19 = vadd.f32 %v556_v9, %v548_v16  ;;  %v671_v9 = vstv %s1726_s19  ;;  %v665_v16 = vstv %s1728_s11  ;;  %s1743_s19 = sld [smem:[#allocation7 + %s769_s25]] }
 0x161   : > { %v563_v3 = vpop.permute.xlu1 %562  ;;  %v561_v4 = vpop.permute.xlu0 %560  ;;  %s1745_s11 = sld [smem:[#allocation7 + %s781_s27]]  ;;  %p1158_p10 = pnand %p1157_p4, %p1874_p9 }
 0x162   : > { %v567_v0 = vmul.f32 %v565_v7, %v563_v3  ;;  %v566_v1 = vmul.f32 %v565_v7, %v561_v4 }
 0x163   : > { %p1159_p11 = pneg %p1158_p10 }
 0x164   : > { %v569_v25 = vadd.f32 %v567_v0, %v559_v18  ;;  %v568_v62 = vadd.f32 %v566_v1, %v558_v19  ;;  %v673_v19 = vmul.f32 %v671_v9, %v1659_v58 }
 0x165   : > { %v575_v11 = vpop.permute.xlu1 %574  ;;  %v573_v14 = vpop.permute.xlu0 %572 }
 0x166   : > { %v579_v20 = vmul.f32 %v577_v10, %v575_v11  ;;  %v578_v21 = vmul.f32 %v577_v10, %v573_v14 }
 0x168   : > { %v581_v60 = vadd.f32 %v579_v20, %v569_v25  ;;  %v580_v28 = vadd.f32 %v578_v21, %v568_v62  ;;  %v672_v20 = vmul.f32 %v671_v9, %v1661_v59  ;;  %v701_v59 = vstv %s978_s23  ;;  %s1016_s23 = sshll.u32 %s1342_s3, 11 }
 0x169   : > { %v585_v22 = vpop.permute.xlu1 %584  ;;  %v583_v23 = vpop.permute.xlu0 %582 }
 0x16a   : > { %v589_v63 = vmul.f32 %v587_v17, %v585_v22  ;;  %v588_v26 = vmul.f32 %v587_v17, %v583_v23 }
 0x16c   : > { %v591_v32 = vadd.f32 %v589_v63, %v581_v60  ;;  %v590_v33 = vadd.f32 %v588_v26, %v580_v28  ;;  %v681_v63 = vstv %s976_s22  ;;  %s1747_s22 = sld [smem:[#allocation7 + %s793_s14]] }
 0x16d   : > { %v595_v61 = vpop.permute.xlu1 %594  ;;  %v593_v29 = vpop.permute.xlu0 %592 }
 0x16e   : > { %v599_v34 = vmul.f32 %v597_v27, %v595_v61  ;;  %v598_v35 = vmul.f32 %v597_v27, %v593_v29  ;;  %v691_v61 = vstv %s977_s1  ;;  %s1749_s1 = sld [smem:[#allocation7 + %s805_s28]] }
 0x170   : > { %v601_v36 = vadd.f32 %v599_v34, %v591_v32  ;;  %v600_v37 = vadd.f32 %v598_v35, %v590_v33 }
 0x171   : > { %v611_v38 = vpop.permute.xlu1 %610  ;;  %v609_v39 = vpop.permute.xlu0 %608 }
 0x172   : > { %v607_v40 = vadd.f32 %v605_v30, %v601_v36  ;;  %v606_v41 = vadd.f32 %v604_v31, %v600_v37  ;;  %v615_v46 = vmul.f32 %v613_v44, %v611_v38  ;;  %v614_v47 = vmul.f32 %v613_v44, %v609_v39 }
 0x174   : > { %v617_v54 = vadd.f32 %v615_v46, %v607_v40  ;;  %v616_v55 = vadd.f32 %v614_v47, %v606_v41 }
 0x175   : > { %v621_v42 = vpop.permute.xlu1 %620  ;;  %v619_v43 = vpop.permute.xlu0 %618 }
 0x176   : > { %v625_v49 = vmul.f32 %v623_v12, %v621_v42  ;;  %v624_v50 = vmul.f32 %v623_v12, %v619_v43 }
 0x178   : > { %v627_v3 = vadd.f32 %v625_v49, %v617_v54  ;;  %v626_v4 = vadd.f32 %v624_v50, %v616_v55  ;;  %v718_v49 = vld [vmem:[%s1431_s26] sm:$0xff]  ;;  %v982_v50 = vld [vmem:[%s1431_s26 + $0x10] sm:$0xff]  ;;  %v991_v55 = vld [vmem:[%s1431_s26 + $0x38] sm:$0xff] }
 0x179   : > { %v631_v13 = vpop.permute.xlu1 %630  ;;  %v629_v45 = vpop.permute.xlu0 %628  ;;  %v990_v54 = vld [vmem:[%s1431_s26 + $0x30] sm:$0xff] }
 0x17a   : > { %v635_v56 = vmul.f32 %v633_v48, %v631_v13  ;;  %v634_v57 = vmul.f32 %v633_v48, %v629_v45  ;;  %v719_v48 = vld [vmem:[%s1431_s26 + $0x8] sm:$0xff] }
 0x17c   : > { %v637_v10 = vadd.f32 %v635_v56, %v627_v3  ;;  %v636_v11 = vadd.f32 %v634_v57, %v626_v4  ;;  %v724_v56 = vstv %s1735_s12  ;;  %v735_v57 = vstv %s1737_s17  ;;  %s814_s12 = scalar_lea.sflag [#allocation10], %s1425_s20  ;;  %s1240_s17 = smov [#allocation11]  }
 0x17d   : > { %v643_v52 = vpop.permute.xlu1 %642  ;;  %v641_v53 = vpop.permute.xlu0 %640  ;;  %v759_v3 = vstv %s1741_s30  ;;  %s1160_s18 = sshll.u32 %s1240_s17, 4  ;;  %s1161_s18 = int_to_ptr.vmem [resolvable:$false] %s1160_s18 }
 0x17e   : > { %v647_v5 = vmul.f32 %v645_v51, %v643_v52  ;;  %v646_v6 = vmul.f32 %v645_v51, %v641_v53  ;;  %v983_v51 = vld [vmem:[%s1431_s26 + $0x18] sm:$0xff]  ;;  %v986_v52 = vld [vmem:[%s1431_s26 + $0x20] sm:$0xff]  ;;  %v987_v53 = vld [vmem:[%s1431_s26 + $0x28] sm:$0xff]  ;;  %s1162_s25 = scalar_lea.vmem %s1161_s18, 4096  ;;  %p1163_p6 = scmp.lt.s32.totalorder %s1802_s24, %s1161_s18 }
 0x17f   : > { %p1164_p8 = scmp.lt.s32.totalorder %s1162_s25, %s1156_s13 }
 0x180   : > { %v649_v0 = vadd.f32 %v647_v5, %v637_v10  ;;  %v648_v1 = vadd.f32 %v646_v6, %v636_v11  ;;  %v771_v5 = vstv %s1743_s19  ;;  %v783_v6 = vstv %s1745_s11 }
 0x181   : > { %v653_v7 = vpop.permute.xlu1 %652  ;;  %v651_v8 = vpop.permute.xlu0 %650  ;;  %p1165_p12 = por %p1164_p8, %p1163_p6 }
 0x182   : > { %v657_v14 = vmul.f32 %v655_v2, %v653_v7  ;;  %v656_v15 = vmul.f32 %v655_v2, %v651_v8  ;;  %v747_v2 = vstv %s1739_s29  ;;  %v795_v7 = vstv %s1747_s22 }
 0x183   : > { %v807_v8 = vstv %s1749_s1  ;;  %p1166_p0 = pnand %p1165_p12, %p1159_p11 }
 0x184   : > { %v659_v21 = vadd.f32 %v657_v14, %v649_v0  ;;  %v658_v22 = vadd.f32 %v656_v15, %v648_v1  ;;  %v995_v0 = vld [vmem:[%s1431_s26 + $0x48] sm:$0xff] }
 0x185   : > { %v663_v17 = vpop.permute.xlu1 %662  ;;  %v661_v18 = vpop.permute.xlu0 %660 }
 0x186   : > { %v667_v23 = vmul.f32 %v665_v16, %v663_v17  ;;  %v666_v24 = vmul.f32 %v665_v16, %v661_v18  ;;  %v994_v16 = vld [vmem:[%s1431_s26 + $0x40] sm:$0xff] }
 0x188   : > { %v669_v25 = vadd.f32 %v667_v23, %v659_v21  ;;  %v668_v62 = vadd.f32 %v666_v24, %v658_v22  ;;  %v999_v21 = vld [vmem:[%s1431_s26 + $0x58] sm:$0xff]  ;;  %v1002_v22 = vld [vmem:[%s1431_s26 + $0x60] sm:$0xff] }
 0x189   : > { %v679_v26 = vpop.permute.xlu1 %678  ;;  %v677_v27 = vpop.permute.xlu0 %676 }
 0x18a   : > { %v675_v60 = vadd.f32 %v673_v19, %v669_v25  ;;  %v674_v28 = vadd.f32 %v672_v20, %v668_v62  ;;  %v683_v29 = vmul.f32 %v681_v63, %v679_v26  ;;  %v682_v30 = vmul.f32 %v681_v63, %v677_v27  ;;  %v998_v20 = vld [vmem:[%s1431_s26 + $0x50] sm:$0xff]  ;;  %v1003_v63 = vld [vmem:[%s1431_s26 + $0x68] sm:$0xff]  ;;  %v1007_v27 = vld [vmem:[%s1431_s26 + $0x78] sm:$0xff] }
 0x18b   : > { %v1006_v26 = vld [vmem:[%s1431_s26 + $0x70] sm:$0xff]  ;;  %s1800_s26 = scalar_lea.hbm %s1864_s5, %s1016_s23 }
 0x18c   : > { %v685_v34 = vadd.f32 %v683_v29, %v675_v60  ;;  %v684_v35 = vadd.f32 %v682_v30, %v674_v28 }
 0x18d   : > { %v689_v31 = vpop.permute.xlu1 %688  ;;  %v687_v32 = vpop.permute.xlu0 %686 }
 0x18e   : > { %v693_v58 = vmul.f32 %v691_v61, %v689_v31  ;;  %v692_v33 = vmul.f32 %v691_v61, %v687_v32 }
 0x190   : > { %v695_v38 = vadd.f32 %v693_v58, %v685_v34  ;;  %v694_v39 = vadd.f32 %v692_v33, %v684_v35 }
 0x191   : > { %v699_v36 = vpop.permute.xlu1 %698  ;;  %v697_v37 = vpop.permute.xlu0 %696 }
 0x192   : > { %v703_v40 = vmul.f32 %v701_v59, %v699_v36  ;;  %v702_v41 = vmul.f32 %v701_v59, %v697_v37 }
 0x194   : > { %v705_v42 = vadd.f32 %v703_v40, %v695_v38  ;;  %v704_v43 = vadd.f32 %v702_v41, %v694_v39 }
 0x196   : > { %v980_v44 = vmul.f32 -1.442695, %v705_v42  ;;  %v979_v12 = vmul.f32 -1.442695, %v704_v43 }
 0x198   : > { %1078 = vpow2.f32 %v980_v44 }
 0x199   : > { %1080 = vpow2.f32 %v979_v12 }
 0x1a2   : > { %v1079_v13 = vpop.eup %1078 }
 0x1a3   : > { %v1081_v45 = vpop.eup %1080  ;;  %v713_v46 = vadd.f32 1.0, %v1079_v13 }
 0x1a4   : > { %v712_v47 = vadd.f32 1.0, %v1081_v45 }
 0x1a5   : > { %1082 = vrcp.f32 %v713_v46 }
 0x1a6   : > { %1084 = vrcp.f32 %v712_v47 }
 0x1af   : > { %v1083_v4 = vpop.eup %1082 }
 0x1b0   : > { %v1085_v9 = vpop.eup %1084  ;;  %v721_v10 = vmul.f32 %v1083_v4, %v719_v48  ;;  %v732_v11 = vmul.f32 %v1083_v4, %v983_v51  ;;  %v744_v14 = vmul.f32 %v1083_v4, %v987_v53  ;;  %v756_v15 = vmul.f32 %v1083_v4, %v991_v55 }
 0x1b1   : > { %v720_v1 = vmul.f32 %v1085_v9, %v718_v49  ;;  %v731_v17 = vmul.f32 %v1085_v9, %v982_v50  ;;  %v743_v18 = vmul.f32 %v1085_v9, %v986_v52  ;;  %v755_v19 = vmul.f32 %v1085_v9, %v990_v54 }
 0x1b2   : > { %v726_v23 = vmul.f32 %v724_v56, %v721_v10  ;;  %v737_v24 = vmul.f32 %v735_v57, %v732_v11  ;;  %v749_v25 = vmul.f32 %v747_v2, %v744_v14  ;;  %v761_v62 = vmul.f32 %v759_v3, %v756_v15 }
 0x1b3   : > { %v725_v60 = vmul.f32 %v724_v56, %v720_v1  ;;  %v736_v28 = vmul.f32 %v735_v57, %v731_v17  ;;  %v748_v61 = vmul.f32 %v747_v2, %v743_v18  ;;  %v760_v29 = vmul.f32 %v759_v3, %v755_v19 }
 0x1b4   : > { %728 = vst.msk [vmem:[%s1778_s9 + $0x8] sm:$0xff] %vm225_vm0, %v726_v23  ;;  %985 = vst.msk [vmem:[%s1778_s9 + $0x18] sm:$0xff] %vm225_vm0, %v737_v24  ;;  %v767_v30 = vmul.f32 %v1085_v9, %v994_v16  ;;  %v768_v31 = vmul.f32 %v1083_v4, %v995_v0  ;;  %v779_v32 = vmul.f32 %v1085_v9, %v998_v20 }
 0x1b5   : > { %989 = vst.msk [vmem:[%s1778_s9 + $0x28] sm:$0xff] %vm225_vm0, %v749_v25  ;;  %993 = vst.msk [vmem:[%s1778_s9 + $0x38] sm:$0xff] %vm225_vm0, %v761_v62  ;;  %v780_v58 = vmul.f32 %v1083_v4, %v999_v21  ;;  %v791_v33 = vmul.f32 %v1085_v9, %v1002_v22  ;;  %v792_v59 = vmul.f32 %v1083_v4, %v1003_v63 }
 0x1b6   : > { %727 = vst.msk [vmem:[%s1778_s9] sm:$0xff] %vm225_vm0, %v725_v60  ;;  %984 = vst.msk [vmem:[%s1778_s9 + $0x10] sm:$0xff] %vm225_vm0, %v736_v28  ;;  %v803_v34 = vmul.f32 %v1085_v9, %v1006_v26  ;;  %v804_v35 = vmul.f32 %v1083_v4, %v1007_v27  ;;  %v772_v36 = vmul.f32 %v771_v5, %v767_v30 }
 0x1b7   : > { %988 = vst.msk [vmem:[%s1778_s9 + $0x20] sm:$0xff] %vm225_vm0, %v748_v61  ;;  %992 = vst.msk [vmem:[%s1778_s9 + $0x30] sm:$0xff] %vm225_vm0, %v760_v29  ;;  %v773_v37 = vmul.f32 %v771_v5, %v768_v31  ;;  %v784_v38 = vmul.f32 %v783_v6, %v779_v32  ;;  %v785_v39 = vmul.f32 %v783_v6, %v780_v58 }
 0x1b8   : > { %v796_v40 = vmul.f32 %v795_v7, %v791_v33  ;;  %v797_v41 = vmul.f32 %v795_v7, %v792_v59  ;;  %v808_v42 = vmul.f32 %v807_v8, %v803_v34  ;;  %v809_v43 = vmul.f32 %v807_v8, %v804_v35  ;;  %996 = vst.msk [vmem:[%s1778_s9 + $0x40] sm:$0xff] %vm225_vm0, %v772_v36 }
 0x1b9   : > { %997 = vst.msk [vmem:[%s1778_s9 + $0x48] sm:$0xff] %vm225_vm0, %v773_v37  ;;  %1000 = vst.msk [vmem:[%s1778_s9 + $0x50] sm:$0xff] %vm225_vm0, %v784_v38 }
 0x1ba   : > { %1001 = vst.msk [vmem:[%s1778_s9 + $0x58] sm:$0xff] %vm225_vm0, %v785_v39  ;;  %1004 = vst.msk [vmem:[%s1778_s9 + $0x60] sm:$0xff] %vm225_vm0, %v796_v40 }
 0x1bb   : > { %1005 = vst.msk [vmem:[%s1778_s9 + $0x68] sm:$0xff] %vm225_vm0, %v797_v41  ;;  %1008 = vst.msk [vmem:[%s1778_s9 + $0x70] sm:$0xff] %vm225_vm0, %v808_v42 }
 0x1bc   : > { %1009 = vst.msk [vmem:[%s1778_s9 + $0x78] sm:$0xff] %vm225_vm0, %v809_v43 }
 0x1bd   : > { %1169 = shalt.err (!%p1166_p0)
}
 0x1be   : > { %s1170_s27 = scalar_lea.hbm %s1800_s26, 2048  ;;  %s1174_s29 = scalar_lea.hbm %s1864_s5, 4096 }
 0x1bf   : > { %p1171_p2 = scmp.ne.s32.totalorder %s1800_s26, %s1170_s27  ;;  %p1175_p7 = scmp.lt.u32.totalorder %s1800_s26, %s1864_s5 }
 0x1c0   : > { %p1176_p13 = scmp.lt.u32.totalorder %s1174_s29, %s1170_s27  ;;  %p1178_p4 = scmp.lt.u32.totalorder %s1170_s27, %s1800_s26 }
 0x1c1   : > { %p1172_p3 = pnand %p1171_p2, %p1874_p9 }
 0x1c2   : > { %p1177_p1 = por %p1176_p13, %p1175_p7 }
 0x1c3   : > { %p1173_p5 = pneg %p1172_p3 }
 0x1c4   : > { %p1179_p10 = por %p1178_p4, %p1177_p1 }
 0x1c6   : > { %p1180_p11 = pnand %p1179_p10, %p1173_p5 }
 0x1c8   : > { %1183 = shalt.err (!%p1180_p11)
}
 0x1c9   : > { %s1241_s11 = smov 128   ;;  %s1242_s22 = smov 8  }
 0x1ca   : > { %1019 = dma.vmem_to_hbm [thread:$0]  (%p1874_p9), %s1802_s24, 2048, %s1800_s26, %s814_s12, %s1241_s11, %s1241_s11, %s1242_s22  }
 0x1cb PF: > { %s842_s1 = sand.u32 1, %s1212_s2   ;;  %p1875_p6 = scmp.ne.s32.totalorder %s1872_s16, 0 }
 0x1cc   : > { %p1876_p8 = scmp.ge.s32.totalorder %s1224_s8, 2  ;;  %s843_s23 = scalar_lea.sflag [#allocation10], %s842_s1 }
 0x1ce   : > { %p1026_p12 = pnand %p1876_p8, %p1875_p6 }
 0x1d0   : > { %1207 = dma.done.wait (!%p1026_p12), %s843_s23, 2048  }
 0x1d1   : > { %1209 = vsyncadd (!%p1026_p12), %s843_s23, 4294965248  ;;  %p28_p0 = scmp.ge.s32.totalorder %s1346_s10, 4   ;;  %s1877_s2 = smov %s1216_s6 }
 0x1d2   : > { %s1878_s6 = smov %s1220_s7  ;;  %s1879_s7 = smov %s1358_s0 }
 0x1d3   : > { %s1880_s8 = smov %s1346_s10  ;;  %30 = sbr.rel (!%p28_p0) target bundleno = 38 (0x26), region = 83 }
 0x1da   :  { %848 = vsyncpa [#allocation9], 1 }
 0x1db   :  { %850 = vsyncpa [#allocation9 + $0x1], 1 }
 0x1dc   :  { %851 = vsyncpa [#allocation10], 1 }
 0x1dd   :  { %853 = vsyncpa [#allocation10 + $0x1], 1 }

</bundles_post_ra>
